<compile_context>
chip_gen: v7x
topology: tpu7x:2x2x1
jax: 0.10.0
libtpu: 0.0.40
codegen_flags: <defaults>
</compile_context>

<pallas_src>
import functools

import jax
import jax.numpy as jnp
from jax.experimental import pallas as pl
from jax.experimental.pallas import tpu as pltpu


# ----------------------------- helpers ---------------------------------------


def _pick_tile(dim, target, align):
    """Full-dim block when small (always legal); otherwise an aligned tile."""
    if dim <= target:
        return dim
    return max(align, (target // align) * align)


def _pad_axis(x, axis, mult):
    pad = (-x.shape[axis]) % mult
    if pad == 0:
        return x
    widths = [(0, 0)] * x.ndim
    widths[axis] = (0, pad)
    return jnp.pad(x, widths)


_M_TILE = 256   # sublane-aligned M tile target (multiple of 8)
_N_TILE = 256   # lane-aligned N tile target (multiple of 128)
_V_TILE = 512   # vocab tile target for the decode head


# ----------------------------- Pallas kernels --------------------------------


def _ln_matmul_kernel(x_ref, g_ref, b_ref, w_ref, bias_ref, o_ref, *, gelu):
    # fused LayerNorm -> matmul (-> gelu).  x: (tm, D) f32, w: (D, tn) bf16.
    x = x_ref[...]
    mean = jnp.mean(x, axis=-1, keepdims=True)
    var = jnp.mean(jnp.square(x - mean), axis=-1, keepdims=True)
    xn = (x - mean) * jax.lax.rsqrt(var + 1e-5) * g_ref[...] + b_ref[...]
    y = jnp.dot(xn.astype(jnp.bfloat16), w_ref[...],
                preferred_element_type=jnp.float32) + bias_ref[...]
    if gelu:
        # GPT-2 "gelu_new" (tanh approximation), kept in f32 (v5e has no bf16 VPU).
        y = 0.5 * y * (1.0 + jnp.tanh(0.7978845608028654 * (y + 0.044715 * y * y * y)))
    o_ref[...] = y


def _matmul_residual_kernel(x_ref, w_ref, bias_ref, res_ref, o_ref):
    # o = res + x @ w + bias   (x: (tm, K) f32 -> bf16, w: (K, tn) bf16)
    o_ref[...] = (
        res_ref[...]
        + bias_ref[...]
        + jnp.dot(x_ref[...].astype(jnp.bfloat16), w_ref[...],
                  preferred_element_type=jnp.float32)
    )


def _attention_kernel(q_ref, k_ref, v_ref, o_ref, *, scale):
    # one batch per grid step, all heads batched; causal softmax attention.
    # q/k/v refs: (1, H, S, Dh) f32.
    q = (q_ref[0] * scale).astype(jnp.bfloat16)   # scale folded into q (small tensor)
    k = k_ref[0].astype(jnp.bfloat16)
    v = v_ref[0].astype(jnp.bfloat16)
    s = jnp.einsum("hqd,hkd->hqk", q, k, preferred_element_type=jnp.float32)
    rows = jax.lax.broadcasted_iota(jnp.int32, s.shape, 1)
    cols = jax.lax.broadcasted_iota(jnp.int32, s.shape, 2)
    s = jnp.where(rows >= cols, s, jnp.float32(-1e9))   # mask applied in f32
    m = jnp.max(s, axis=-1, keepdims=True)
    p = jnp.exp(s - m)
    p = p / jnp.sum(p, axis=-1, keepdims=True)
    # TODO(synk): for long sequences, replace with a flash-style online-softmax
    # over a KV grid axis and lane-dense (S_tile, H*Dh) packed layout.
    o_ref[0] = jnp.einsum("hqk,hkd->hqd", p.astype(jnp.bfloat16), v,
                          preferred_element_type=jnp.float32)


def _ln_decode_kernel(x_ref, g_ref, b_ref, wte_ref, o_ref):
    # fused final-LayerNorm -> tied word-decoding matmul (contract on D of wte),
    # so wte.T is never materialized.  x: (tm, D) f32, wte: (tv, D) bf16.
    x = x_ref[...]
    mean = jnp.mean(x, axis=-1, keepdims=True)
    var = jnp.mean(jnp.square(x - mean), axis=-1, keepdims=True)
    xn = ((x - mean) * jax.lax.rsqrt(var + 1e-5) * g_ref[...] + b_ref[...]
          ).astype(jnp.bfloat16)
    o_ref[...] = jax.lax.dot_general(
        xn, wte_ref[...],
        dimension_numbers=(((1,), (1,)), ((), ())),
        preferred_element_type=jnp.float32)


def _softmax_argmax_kernel(logit_ref, prob_ref, pred_ref):
    logits = logit_ref[...]                      # (tm, V) f32
    m = jnp.max(logits, axis=-1, keepdims=True)
    e = jnp.exp(logits - m)
    prob_ref[...] = e / jnp.sum(e, axis=-1, keepdims=True)
    V = logits.shape[-1]
    col = jax.lax.broadcasted_iota(jnp.int32, logits.shape, 1)
    idx = jnp.where(logits == m, col, jnp.int32(V))
    pred_ref[...] = jnp.min(idx, axis=-1, keepdims=True)
    # TODO(synk): for real vocab sizes (V~50k), tile over V with running
    # (max, sum, argmax) scratch instead of a full-V row block.


# ----------------------------- kernel wrappers --------------------------------


def ln_matmul(x, gamma, beta, w, bias, *, gelu=False):
    """(LayerNorm(x) @ w + bias), optionally gelu.  x:(M,D) f32, w:(D,N) bf16."""
    M, D = x.shape
    N = w.shape[1]
    tm = _pick_tile(M, _M_TILE, 8)
    tn = _pick_tile(N, _N_TILE, 128)
    xp = _pad_axis(x, 0, tm)
    wp = _pad_axis(w, 1, tn)
    bp = _pad_axis(bias.reshape(1, N), 1, tn)
    Mp, Np = xp.shape[0], wp.shape[1]
    out = pl.pallas_call(
        functools.partial(_ln_matmul_kernel, gelu=gelu),
        out_shape=jax.ShapeDtypeStruct((Mp, Np), jnp.float32),
        grid=(Mp // tm, Np // tn),
        in_specs=[
            pl.BlockSpec((tm, D), lambda i, j: (i, 0)),
            pl.BlockSpec((1, D), lambda i, j: (0, 0)),
            pl.BlockSpec((1, D), lambda i, j: (0, 0)),
            pl.BlockSpec((D, tn), lambda i, j: (0, j)),
            pl.BlockSpec((1, tn), lambda i, j: (0, j)),
        ],
        out_specs=pl.BlockSpec((tm, tn), lambda i, j: (i, j)),
        compiler_params=pltpu.CompilerParams(
            dimension_semantics=("parallel", "parallel")),
    )(xp, gamma.reshape(1, D), beta.reshape(1, D), wp, bp)
    return out[:M, :N]


def matmul_residual(x, w, bias, res):
    """res + x @ w + bias.  x:(M,K) f32, w:(K,N) bf16, res:(M,N) f32."""
    M, K = x.shape
    N = w.shape[1]
    tm = _pick_tile(M, _M_TILE, 8)
    tn = _pick_tile(N, _N_TILE, 128)
    xp = _pad_axis(x, 0, tm)
    wp = _pad_axis(w, 1, tn)
    bp = _pad_axis(bias.reshape(1, N), 1, tn)
    rp = _pad_axis(_pad_axis(res, 0, tm), 1, tn)
    Mp, Np = xp.shape[0], wp.shape[1]
    out = pl.pallas_call(
        _matmul_residual_kernel,
        out_shape=jax.ShapeDtypeStruct((Mp, Np), jnp.float32),
        grid=(Mp // tm, Np // tn),
        in_specs=[
            pl.BlockSpec((tm, K), lambda i, j: (i, 0)),
            pl.BlockSpec((K, tn), lambda i, j: (0, j)),
            pl.BlockSpec((1, tn), lambda i, j: (0, j)),
            pl.BlockSpec((tm, tn), lambda i, j: (i, j)),
        ],
        out_specs=pl.BlockSpec((tm, tn), lambda i, j: (i, j)),
        compiler_params=pltpu.CompilerParams(
            dimension_semantics=("parallel", "parallel")),
    )(xp, wp, bp, rp)
    return out[:M, :N]


def attention(q, k, v):
    """Causal multi-head attention.  q/k/v: (B, H, S, Dh) f32."""
    B, H, S, Dh = q.shape
    kern = functools.partial(_attention_kernel, scale=1.0 / (Dh ** 0.5))
    spec = pl.BlockSpec((1, H, S, Dh), lambda b: (b, 0, 0, 0))
    return pl.pallas_call(
        kern,
        out_shape=jax.ShapeDtypeStruct((B, H, S, Dh), jnp.float32),
        grid=(B,),
        in_specs=[spec, spec, spec],
        out_specs=spec,
        compiler_params=pltpu.CompilerParams(dimension_semantics=("parallel",)),
    )(q, k, v)


def ln_decode(x, gamma, beta, wte):
    """LayerNorm(x) @ wte.T without materializing wte.T.  wte:(V,D) bf16."""
    M, D = x.shape
    V = wte.shape[0]
    tm = _pick_tile(M, _M_TILE, 8)
    tv = _pick_tile(V, _V_TILE, 128)
    xp = _pad_axis(x, 0, tm)
    wp = _pad_axis(wte, 0, tv)
    Mp, Vp = xp.shape[0], wp.shape[0]
    out = pl.pallas_call(
        _ln_decode_kernel,
        out_shape=jax.ShapeDtypeStruct((Mp, Vp), jnp.float32),
        grid=(Mp // tm, Vp // tv),
        in_specs=[
            pl.BlockSpec((tm, D), lambda i, j: (i, 0)),
            pl.BlockSpec((1, D), lambda i, j: (0, 0)),
            pl.BlockSpec((1, D), lambda i, j: (0, 0)),
            pl.BlockSpec((tv, D), lambda i, j: (j, 0)),
        ],
        out_specs=pl.BlockSpec((tm, tv), lambda i, j: (i, j)),
        compiler_params=pltpu.CompilerParams(
            dimension_semantics=("parallel", "parallel")),
    )(xp, gamma.reshape(1, D), beta.reshape(1, D), wp)
    return out[:M, :V]


def softmax_argmax(logits):
    """Row softmax + argmax over full-V rows, tiled over M."""
    M, V = logits.shape
    tm = _pick_tile(M, _M_TILE, 8)
    lp = _pad_axis(logits, 0, tm)
    Mp = lp.shape[0]
    prob, pred = pl.pallas_call(
        _softmax_argmax_kernel,
        out_shape=(
            jax.ShapeDtypeStruct((Mp, V), jnp.float32),
            jax.ShapeDtypeStruct((Mp, 1), jnp.int32),
        ),
        grid=(Mp // tm,),
        in_specs=[pl.BlockSpec((tm, V), lambda i: (i, 0))],
        out_specs=(
            pl.BlockSpec((tm, V), lambda i: (i, 0)),
            pl.BlockSpec((tm, 1), lambda i: (i, 0)),
        ),
        compiler_params=pltpu.CompilerParams(dimension_semantics=("parallel",)),
    )(lp)
    return prob[:M], pred[:M, 0]


# ------------------------------ model glue ------------------------------------


def init_params(key, *, n_layer, n_embedding, n_state_ffn, n_context,
                vocab_size, initializer_range=0.02):
    D, F = n_embedding, n_state_ffn
    keys = jax.random.split(key, 2 + 4 * n_layer)
    ki = iter(keys)

    def nrm(k, shp, dtype=jnp.bfloat16):
        return (initializer_range * jax.random.normal(k, shp, jnp.float32)).astype(dtype)

    params = {
        "wte": nrm(next(ki), (vocab_size, D)),              # tied embed/decode, bf16
        "wpe": nrm(next(ki), (n_context, D), jnp.float32),  # position embedding
        "lnf_g": jnp.ones((D,), jnp.float32),
        "lnf_b": jnp.zeros((D,), jnp.float32),
        "layers": [],
    }
    for _ in range(n_layer):
        params["layers"].append({
            "ln1_g": jnp.ones((D,), jnp.float32),
            "ln1_b": jnp.zeros((D,), jnp.float32),
            "w_qkv": nrm(next(ki), (D, 3 * D)),
            "b_qkv": jnp.zeros((3 * D,), jnp.float32),
            "w_proj": nrm(next(ki), (D, D)),
            "b_proj": jnp.zeros((D,), jnp.float32),
            "ln2_g": jnp.ones((D,), jnp.float32),
            "ln2_b": jnp.zeros((D,), jnp.float32),
            "w_fc": nrm(next(ki), (D, F)),
            "b_fc": jnp.zeros((F,), jnp.float32),
            "w_out": nrm(next(ki), (F, D)),
            "b_out": jnp.zeros((D,), jnp.float32),
        })
    return params


def gpt2_forward(params, x_ids, *, n_head):
    """Returns (output, prob, pred) with shapes (B,S,V), (B,S,V), (B,S)."""
    B, S = x_ids.shape
    wte = params["wte"]                      # (V, D) bf16
    D = wte.shape[1]
    H = n_head
    Dh = D // H

    # embedding lookup (gather glue, plain JAX)
    h = wte[x_ids].astype(jnp.float32) + params["wpe"][:S][None, :, :]
    h = h.reshape(B * S, D)

    def heads(t):  # (B*S, D) -> (B, H, S, Dh)
        return t.reshape(B, S, H, Dh).transpose(0, 2, 1, 3)

    for layer in params["layers"]:
        # --- causal self-attention block (LN1 fused into QKV matmul) ---
        qkv = ln_matmul(h, layer["ln1_g"], layer["ln1_b"],
                        layer["w_qkv"], layer["b_qkv"])          # (B*S, 3D)
        q, k, v = jnp.split(qkv, 3, axis=1)
        o = attention(heads(q), heads(k), heads(v))              # (B, H, S, Dh)
        o = o.transpose(0, 2, 1, 3).reshape(B * S, D)
        h = matmul_residual(o, layer["w_proj"], layer["b_proj"], h)
        # --- MLP block (LN2 fused into fc matmul; residual fused into out matmul) ---
        h1 = ln_matmul(h, layer["ln2_g"], layer["ln2_b"],
                       layer["w_fc"], layer["b_fc"], gelu=True)  # (B*S, F)
        h = matmul_residual(h1, layer["w_out"], layer["b_out"], h)

    # final LayerNorm fused into tied word-decoding matmul (vocab-tiled)
    logits = ln_decode(h, params["lnf_g"], params["lnf_b"], wte)  # (B*S, V)
    prob, pred = softmax_argmax(logits)

    V = wte.shape[0]
    return (
        logits.reshape(B, S, V),
        prob.reshape(B, S, V),
        pred.reshape(B, S),   # TODO(synk): int32 (PyTorch reference returns int64)
    )


# --------------------------------- main ----------------------------------------


if __name__ == "__main__":
    n_layer = 2
    n_embedding = 32
    n_state_ffn = 64
    n_head = 4
    n_context = 16
    vocab_size = 128
    batch, seq = 2, 8

    key = jax.random.PRNGKey(0)
    k_param, k_tok = jax.random.split(key)
    params = init_params(
        k_param,
        n_layer=n_layer,
        n_embedding=n_embedding,
        n_state_ffn=n_state_ffn,
        n_context=n_context,
        vocab_size=vocab_size,
    )
    x = jax.random.randint(k_tok, (batch, seq), 0, vocab_size, dtype=jnp.int32)

    fwd = jax.jit(functools.partial(gpt2_forward, n_head=n_head))
    output, prob, pred = fwd(params, x)
    jax.block_until_ready((output, prob, pred))

    assert output.shape == (batch, seq, vocab_size)
    assert prob.shape == (batch, seq, vocab_size)
    assert pred.shape == (batch, seq)
    assert bool(jnp.all(jnp.isfinite(output)))
    assert bool(jnp.allclose(jnp.sum(prob, axis=-1), 1.0, atol=1e-4))
    print("KERNEL_OK")
</pallas_src>

<mosaic_0001>
module attributes {stable_mosaic.version = 11 : i64} {
  func.func @_ln_matmul_kernel(%arg0: i32, %arg1: i32, %arg2: memref<16x32xf32, #tpu.memory_space<vmem>>, %arg3: memref<1x32xf32, #tpu.memory_space<vmem>>, %arg4: memref<1x32xf32, #tpu.memory_space<vmem>>, %arg5: memref<32x96xbf16, #tpu.memory_space<vmem>>, %arg6: memref<1x96xf32, #tpu.memory_space<vmem>>, %arg7: memref<16x96xf32, #tpu.memory_space<vmem>>) attributes {dimension_semantics = [#tpu.dimension_semantics<parallel>, #tpu.dimension_semantics<parallel>], iteration_bounds = array<i64: 1, 1>, scalar_prefetch = 0 : i64, scratch_operands = 0 : i64, tpu.core_type = #tpu.core_type<tc>, window_params = [{transform_indices = @transform_0, window_bounds = array<i64: 16, 32>}, {pipeline_mode = #tpu.pipeline_mode<synchronous>, transform_indices = @transform_1, window_bounds = array<i64: 1, 32>}, {pipeline_mode = #tpu.pipeline_mode<synchronous>, transform_indices = @transform_2, window_bounds = array<i64: 1, 32>}, {transform_indices = @transform_3, window_bounds = array<i64: 32, 96>}, {transform_indices = @transform_4, window_bounds = array<i64: 1, 96>}, {transform_indices = @transform_5, window_bounds = array<i64: 16, 96>}]} {
    %c0 = arith.constant 0 : index
    %c0_0 = arith.constant 0 : index
    %0 = vector.load %arg2[%c0, %c0_0] : memref<16x32xf32, #tpu.memory_space<vmem>>, vector<16x32xf32>
    %cst = arith.constant dense<0.000000e+00> : vector<16xf32>
    %1 = vector.multi_reduction <add>, %0, %cst [1] : vector<16x32xf32> to vector<16xf32>
    %2 = vector.shape_cast %1 : vector<16xf32> to vector<16x1xf32>
    %cst_1 = arith.constant 3.200000e+01 : f32
    %3 = vector.broadcast %cst_1 : f32 to vector<16x1xf32>
    %4 = arith.divf %2, %3 : vector<16x1xf32>
    %5 = vector.broadcast %4 : vector<16x1xf32> to vector<16x32xf32>
    %6 = arith.subf %0, %5 : vector<16x32xf32>
    %7 = arith.mulf %6, %6 : vector<16x32xf32>
    %cst_2 = arith.constant dense<0.000000e+00> : vector<16xf32>
    %8 = vector.multi_reduction <add>, %7, %cst_2 [1] : vector<16x32xf32> to vector<16xf32>
    %9 = vector.shape_cast %8 : vector<16xf32> to vector<16x1xf32>
    %cst_3 = arith.constant 3.200000e+01 : f32
    %10 = vector.broadcast %cst_3 : f32 to vector<16x1xf32>
    %11 = arith.divf %9, %10 : vector<16x1xf32>
    %12 = vector.broadcast %4 : vector<16x1xf32> to vector<16x32xf32>
    %13 = arith.subf %0, %12 : vector<16x32xf32>
    %cst_4 = arith.constant 9.99999974E-6 : f32
    %14 = vector.broadcast %cst_4 : f32 to vector<16x1xf32>
    %15 = arith.addf %11, %14 : vector<16x1xf32>
    %16 = math.rsqrt %15 : vector<16x1xf32>
    %17 = vector.broadcast %16 : vector<16x1xf32> to vector<16x32xf32>
    %18 = arith.mulf %13, %17 : vector<16x32xf32>
    %c0_5 = arith.constant 0 : index
    %c0_6 = arith.constant 0 : index
    %19 = vector.load %arg3[%c0_5, %c0_6] : memref<1x32xf32, #tpu.memory_space<vmem>>, vector<1x32xf32>
    %20 = vector.broadcast %19 : vector<1x32xf32> to vector<16x32xf32>
    %21 = arith.mulf %18, %20 : vector<16x32xf32>
    %c0_7 = arith.constant 0 : index
    %c0_8 = arith.constant 0 : index
    %22 = vector.load %arg4[%c0_7, %c0_8] : memref<1x32xf32, #tpu.memory_space<vmem>>, vector<1x32xf32>
    %23 = vector.broadcast %22 : vector<1x32xf32> to vector<16x32xf32>
    %24 = arith.addf %21, %23 : vector<16x32xf32>
    %25 = arith.truncf %24 : vector<16x32xf32> to vector<16x32xbf16>
    %c0_9 = arith.constant 0 : index
    %c0_10 = arith.constant 0 : index
    %26 = vector.load %arg5[%c0_9, %c0_10] : memref<32x96xbf16, #tpu.memory_space<vmem>>, vector<32x96xbf16>
    %cst_11 = arith.constant dense<0.000000e+00> : vector<16x96xf32>
    %27 = tpu.matmul %25, %26, %cst_11 {dimension_numbers = #tpu.dot_dimension_numbers<[1], [0], [0], [1], [0, 0, 1, 1], [], []>} : vector<16x32xbf16>, vector<32x96xbf16>, vector<16x96xf32> -> vector<16x96xf32>
    %c0_12 = arith.constant 0 : index
    %c0_13 = arith.constant 0 : index
    %28 = vector.load %arg6[%c0_12, %c0_13] : memref<1x96xf32, #tpu.memory_space<vmem>>, vector<1x96xf32>
    %29 = vector.broadcast %28 : vector<1x96xf32> to vector<16x96xf32>
    %30 = arith.addf %27, %29 : vector<16x96xf32>
    %c0_14 = arith.constant 0 : index
    %c0_15 = arith.constant 0 : index
    %31 = vector.load %arg7[%c0_14, %c0_15] : memref<16x96xf32, #tpu.memory_space<vmem>>, vector<16x96xf32>
    tpu.vector_store %arg7[%c0_14, %c0_15], %30 {strides = array<i32>} : memref<16x96xf32, #tpu.memory_space<vmem>>, vector<16x96xf32>,
    return
  }
  func.func @transform_0(%arg0: i32, %arg1: i32) -> (i32, i32) {
    %c0_i32 = arith.constant 0 : i32
    %c0_i32_0 = arith.constant 0 : i32
    return %arg0, %c0_i32 : i32, i32
  }
  func.func @transform_1(%arg0: i32, %arg1: i32) -> (i32, i32) {
    %c0_i32 = arith.constant 0 : i32
    %c0_i32_0 = arith.constant 0 : i32
    %c0_i32_1 = arith.constant 0 : i32
    return %c0_i32, %c0_i32_0 : i32, i32
  }
  func.func @transform_2(%arg0: i32, %arg1: i32) -> (i32, i32) {
    %c0_i32 = arith.constant 0 : i32
    %c0_i32_0 = arith.constant 0 : i32
    %c0_i32_1 = arith.constant 0 : i32
    return %c0_i32, %c0_i32_0 : i32, i32
  }
  func.func @transform_3(%arg0: i32, %arg1: i32) -> (i32, i32) {
    %c0_i32 = arith.constant 0 : i32
    %c0_i32_0 = arith.constant 0 : i32
    return %c0_i32, %arg1 : i32, i32
  }
  func.func @transform_4(%arg0: i32, %arg1: i32) -> (i32, i32) {
    %c0_i32 = arith.constant 0 : i32
    %c0_i32_0 = arith.constant 0 : i32
    return %c0_i32, %arg1 : i32, i32
  }
  func.func @transform_5(%arg0: i32, %arg1: i32) -> (i32, i32) {
    %c0_i32 = arith.constant 0 : i32
    return %arg0, %arg1 : i32, i32
  }
}

module attributes {stable_mosaic.version = 11 : i64} {
  func.func @_attention_kernel(%arg0: i32, %arg1: memref<1x4x8x8xf32, #tpu.memory_space<vmem>>, %arg2: memref<1x4x8x8xf32, #tpu.memory_space<vmem>>, %arg3: memref<1x4x8x8xf32, #tpu.memory_space<vmem>>, %arg4: memref<1x4x8x8xf32, #tpu.memory_space<vmem>>) attributes {dimension_semantics = [#tpu.dimension_semantics<parallel>], iteration_bounds = array<i64: 2>, scalar_prefetch = 0 : i64, scratch_operands = 0 : i64, tpu.core_type = #tpu.core_type<tc>, window_params = [{transform_indices = @transform_0, window_bounds = array<i64: 1, 4, 8, 8>}, {transform_indices = @transform_1, window_bounds = array<i64: 1, 4, 8, 8>}, {transform_indices = @transform_2, window_bounds = array<i64: 1, 4, 8, 8>}, {transform_indices = @transform_3, window_bounds = array<i64: 1, 4, 8, 8>}]} {
    %c0 = arith.constant 0 : index
    %c0_0 = arith.constant 0 : index
    %c0_1 = arith.constant 0 : index
    %c0_2 = arith.constant 0 : index
    %0 = vector.load %arg1[%c0, %c0_0, %c0_1, %c0_2] : memref<1x4x8x8xf32, #tpu.memory_space<vmem>>, vector<1x4x8x8xf32>
    %1 = vector.shape_cast %0 : vector<1x4x8x8xf32> to vector<4x8x8xf32>
    %cst = arith.constant 0.353553385 : f32
    %2 = vector.broadcast %cst : f32 to vector<4x8x8xf32>
    %3 = arith.mulf %1, %2 : vector<4x8x8xf32>
    %4 = arith.truncf %3 : vector<4x8x8xf32> to vector<4x8x8xbf16>
    %c0_3 = arith.constant 0 : index
    %c0_4 = arith.constant 0 : index
    %c0_5 = arith.constant 0 : index
    %c0_6 = arith.constant 0 : index
    %5 = vector.load %arg2[%c0_3, %c0_4, %c0_5, %c0_6] : memref<1x4x8x8xf32, #tpu.memory_space<vmem>>, vector<1x4x8x8xf32>
    %6 = vector.shape_cast %5 : vector<1x4x8x8xf32> to vector<4x8x8xf32>
    %7 = arith.truncf %6 : vector<4x8x8xf32> to vector<4x8x8xbf16>
    %c0_7 = arith.constant 0 : index
    %c0_8 = arith.constant 0 : index
    %c0_9 = arith.constant 0 : index
    %c0_10 = arith.constant 0 : index
    %8 = vector.load %arg3[%c0_7, %c0_8, %c0_9, %c0_10] : memref<1x4x8x8xf32, #tpu.memory_space<vmem>>, vector<1x4x8x8xf32>
    %9 = vector.shape_cast %8 : vector<1x4x8x8xf32> to vector<4x8x8xf32>
    %10 = arith.truncf %9 : vector<4x8x8xf32> to vector<4x8x8xbf16>
    "tpu.trace_start"() <{level = 10 : i32, message = "hqd,hkd->hqk"}> : () -> ()
    %cst_11 = arith.constant dense<0.000000e+00> : vector<4x8x8xf32>
    %11 = tpu.matmul %4, %7, %cst_11 {dimension_numbers = #tpu.dot_dimension_numbers<[2], [2], [1], [1], [0, 0, 0, 1, 1, 1], [0], [0]>} : vector<4x8x8xbf16>, vector<4x8x8xbf16>, vector<4x8x8xf32> -> vector<4x8x8xf32>
    "tpu.trace_stop"() : () -> ()
    %12 = tpu.iota {dimensions = array<i32: 1>} : vector<4x8x8xi32>
    %13 = tpu.iota {dimensions = array<i32: 2>} : vector<4x8x8xi32>
    %14 = arith.cmpi sge, %12, %13 : vector<4x8x8xi32>
    %cst_12 = arith.constant -1.000000e+09 : f32
    %15 = vector.broadcast %cst_12 : f32 to vector<4x8x8xf32>
    %16 = arith.select %14, %11, %15 : vector<4x8x8xi1>, vector<4x8x8xf32>
    %cst_13 = arith.constant dense<0xFF800000> : vector<4x8xf32>
    %17 = vector.multi_reduction <maximumf>, %16, %cst_13 [2] : vector<4x8x8xf32> to vector<4x8xf32>
    %18 = vector.shape_cast %17 : vector<4x8xf32> to vector<4x8x1xf32>
    %19 = vector.broadcast %18 : vector<4x8x1xf32> to vector<4x8x8xf32>
    %20 = arith.subf %16, %19 : vector<4x8x8xf32>
    %21 = math.exp %20 : vector<4x8x8xf32>
    %cst_14 = arith.constant dense<0.000000e+00> : vector<4x8xf32>
    %22 = vector.multi_reduction <add>, %21, %cst_14 [2] : vector<4x8x8xf32> to vector<4x8xf32>
    %23 = vector.shape_cast %22 : vector<4x8xf32> to vector<4x8x1xf32>
    %24 = vector.broadcast %23 : vector<4x8x1xf32> to vector<4x8x8xf32>
    %25 = arith.divf %21, %24 : vector<4x8x8xf32>
    %26 = arith.truncf %25 : vector<4x8x8xf32> to vector<4x8x8xbf16>
    "tpu.trace_start"() <{level = 10 : i32, message = "hqk,hkd->hqd"}> : () -> ()
    %cst_15 = arith.constant dense<0.000000e+00> : vector<4x8x8xf32>
    %27 = tpu.matmul %26, %10, %cst_15 {dimension_numbers = #tpu.dot_dimension_numbers<[2], [1], [1], [2], [0, 0, 0, 1, 1, 2], [0], [0]>} : vector<4x8x8xbf16>, vector<4x8x8xbf16>, vector<4x8x8xf32> -> vector<4x8x8xf32>
    "tpu.trace_stop"() : () -> ()
    %c0_16 = arith.constant 0 : index
    %c0_17 = arith.constant 0 : index
    %c0_18 = arith.constant 0 : index
    %c0_19 = arith.constant 0 : index
    %28 = vector.load %arg4[%c0_16, %c0_17, %c0_18, %c0_19] : memref<1x4x8x8xf32, #tpu.memory_space<vmem>>, vector<1x4x8x8xf32>
    %29 = vector.shape_cast %28 : vector<1x4x8x8xf32> to vector<4x8x8xf32>
    %30 = vector.shape_cast %27 : vector<4x8x8xf32> to vector<1x4x8x8xf32>
    tpu.vector_store %arg4[%c0_16, %c0_17, %c0_18, %c0_19], %30 {strides = array<i32>} : memref<1x4x8x8xf32, #tpu.memory_space<vmem>>, vector<1x4x8x8xf32>,
    return
  }
  func.func @transform_0(%arg0: i32) -> (i32, i32, i32, i32) {
    %c0_i32 = arith.constant 0 : i32
    %c0_i32_0 = arith.constant 0 : i32
    %c0_i32_1 = arith.constant 0 : i32
    %c0_i32_2 = arith.constant 0 : i32
    return %arg0, %c0_i32, %c0_i32_0, %c0_i32_1 : i32, i32, i32, i32
  }
  func.func @transform_1(%arg0: i32) -> (i32, i32, i32, i32) {
    %c0_i32 = arith.constant 0 : i32
    %c0_i32_0 = arith.constant 0 : i32
    %c0_i32_1 = arith.constant 0 : i32
    %c0_i32_2 = arith.constant 0 : i32
    return %arg0, %c0_i32, %c0_i32_0, %c0_i32_1 : i32, i32, i32, i32
  }
  func.func @transform_2(%arg0: i32) -> (i32, i32, i32, i32) {
    %c0_i32 = arith.constant 0 : i32
    %c0_i32_0 = arith.constant 0 : i32
    %c0_i32_1 = arith.constant 0 : i32
    %c0_i32_2 = arith.constant 0 : i32
    return %arg0, %c0_i32, %c0_i32_0, %c0_i32_1 : i32, i32, i32, i32
  }
  func.func @transform_3(%arg0: i32) -> (i32, i32, i32, i32) {
    %c0_i32 = arith.constant 0 : i32
    %c0_i32_0 = arith.constant 0 : i32
    %c0_i32_1 = arith.constant 0 : i32
    %c0_i32_2 = arith.constant 0 : i32
    return %arg0, %c0_i32, %c0_i32_0, %c0_i32_1 : i32, i32, i32, i32
  }
}

module attributes {stable_mosaic.version = 11 : i64} {
  func.func @_matmul_residual_kernel(%arg0: i32, %arg1: i32, %arg2: memref<16x32xf32, #tpu.memory_space<vmem>>, %arg3: memref<32x32xbf16, #tpu.memory_space<vmem>>, %arg4: memref<1x32xf32, #tpu.memory_space<vmem>>, %arg5: memref<16x32xf32, #tpu.memory_space<vmem>>, %arg6: memref<16x32xf32, #tpu.memory_space<vmem>>) attributes {dimension_semantics = [#tpu.dimension_semantics<parallel>, #tpu.dimension_semantics<parallel>], iteration_bounds = array<i64: 1, 1>, scalar_prefetch = 0 : i64, scratch_operands = 0 : i64, tpu.core_type = #tpu.core_type<tc>, window_params = [{transform_indices = @transform_0, window_bounds = array<i64: 16, 32>}, {transform_indices = @transform_1, window_bounds = array<i64: 32, 32>}, {transform_indices = @transform_2, window_bounds = array<i64: 1, 32>}, {transform_indices = @transform_3, window_bounds = array<i64: 16, 32>}, {transform_indices = @transform_4, window_bounds = array<i64: 16, 32>}]} {
    %c0 = arith.constant 0 : index
    %c0_0 = arith.constant 0 : index
    %0 = vector.load %arg5[%c0, %c0_0] : memref<16x32xf32, #tpu.memory_space<vmem>>, vector<16x32xf32>
    %c0_1 = arith.constant 0 : index
    %c0_2 = arith.constant 0 : index
    %1 = vector.load %arg4[%c0_1, %c0_2] : memref<1x32xf32, #tpu.memory_space<vmem>>, vector<1x32xf32>
    %2 = vector.broadcast %1 : vector<1x32xf32> to vector<16x32xf32>
    %3 = arith.addf %0, %2 : vector<16x32xf32>
    %c0_3 = arith.constant 0 : index
    %c0_4 = arith.constant 0 : index
    %4 = vector.load %arg2[%c0_3, %c0_4] : memref<16x32xf32, #tpu.memory_space<vmem>>, vector<16x32xf32>
    %5 = arith.truncf %4 : vector<16x32xf32> to vector<16x32xbf16>
    %c0_5 = arith.constant 0 : index
    %c0_6 = arith.constant 0 : index
    %6 = vector.load %arg3[%c0_5, %c0_6] : memref<32x32xbf16, #tpu.memory_space<vmem>>, vector<32x32xbf16>
    %cst = arith.constant dense<0.000000e+00> : vector<16x32xf32>
    %7 = tpu.matmul %5, %6, %cst {dimension_numbers = #tpu.dot_dimension_numbers<[1], [0], [0], [1], [0, 0, 1, 1], [], []>} : vector<16x32xbf16>, vector<32x32xbf16>, vector<16x32xf32> -> vector<16x32xf32>
    %8 = arith.addf %3, %7 : vector<16x32xf32>
    %c0_7 = arith.constant 0 : index
    %c0_8 = arith.constant 0 : index
    %9 = vector.load %arg6[%c0_7, %c0_8] : memref<16x32xf32, #tpu.memory_space<vmem>>, vector<16x32xf32>
    tpu.vector_store %arg6[%c0_7, %c0_8], %8 {strides = array<i32>} : memref<16x32xf32, #tpu.memory_space<vmem>>, vector<16x32xf32>,
    return
  }
  func.func @transform_0(%arg0: i32, %arg1: i32) -> (i32, i32) {
    %c0_i32 = arith.constant 0 : i32
    %c0_i32_0 = arith.constant 0 : i32
    return %arg0, %c0_i32 : i32, i32
  }
  func.func @transform_1(%arg0: i32, %arg1: i32) -> (i32, i32) {
    %c0_i32 = arith.constant 0 : i32
    %c0_i32_0 = arith.constant 0 : i32
    return %c0_i32, %arg1 : i32, i32
  }
  func.func @transform_2(%arg0: i32, %arg1: i32) -> (i32, i32) {
    %c0_i32 = arith.constant 0 : i32
    %c0_i32_0 = arith.constant 0 : i32
    return %c0_i32, %arg1 : i32, i32
  }
  func.func @transform_3(%arg0: i32, %arg1: i32) -> (i32, i32) {
    %c0_i32 = arith.constant 0 : i32
    return %arg0, %arg1 : i32, i32
  }
  func.func @transform_4(%arg0: i32, %arg1: i32) -> (i32, i32) {
    %c0_i32 = arith.constant 0 : i32
    return %arg0, %arg1 : i32, i32
  }
}

module attributes {stable_mosaic.version = 11 : i64} {
  func.func @_ln_matmul_kernel(%arg0: i32, %arg1: i32, %arg2: memref<16x32xf32, #tpu.memory_space<vmem>>, %arg3: memref<1x32xf32, #tpu.memory_space<vmem>>, %arg4: memref<1x32xf32, #tpu.memory_space<vmem>>, %arg5: memref<32x64xbf16, #tpu.memory_space<vmem>>, %arg6: memref<1x64xf32, #tpu.memory_space<vmem>>, %arg7: memref<16x64xf32, #tpu.memory_space<vmem>>) attributes {dimension_semantics = [#tpu.dimension_semantics<parallel>, #tpu.dimension_semantics<parallel>], iteration_bounds = array<i64: 1, 1>, scalar_prefetch = 0 : i64, scratch_operands = 0 : i64, tpu.core_type = #tpu.core_type<tc>, window_params = [{transform_indices = @transform_0, window_bounds = array<i64: 16, 32>}, {pipeline_mode = #tpu.pipeline_mode<synchronous>, transform_indices = @transform_1, window_bounds = array<i64: 1, 32>}, {pipeline_mode = #tpu.pipeline_mode<synchronous>, transform_indices = @transform_2, window_bounds = array<i64: 1, 32>}, {transform_indices = @transform_3, window_bounds = array<i64: 32, 64>}, {transform_indices = @transform_4, window_bounds = array<i64: 1, 64>}, {transform_indices = @transform_5, window_bounds = array<i64: 16, 64>}]} {
    %c0 = arith.constant 0 : index
    %c0_0 = arith.constant 0 : index
    %0 = vector.load %arg2[%c0, %c0_0] : memref<16x32xf32, #tpu.memory_space<vmem>>, vector<16x32xf32>
    %cst = arith.constant dense<0.000000e+00> : vector<16xf32>
    %1 = vector.multi_reduction <add>, %0, %cst [1] : vector<16x32xf32> to vector<16xf32>
    %2 = vector.shape_cast %1 : vector<16xf32> to vector<16x1xf32>
    %cst_1 = arith.constant 3.200000e+01 : f32
    %3 = vector.broadcast %cst_1 : f32 to vector<16x1xf32>
    %4 = arith.divf %2, %3 : vector<16x1xf32>
    %5 = vector.broadcast %4 : vector<16x1xf32> to vector<16x32xf32>
    %6 = arith.subf %0, %5 : vector<16x32xf32>
    %7 = arith.mulf %6, %6 : vector<16x32xf32>
    %cst_2 = arith.constant dense<0.000000e+00> : vector<16xf32>
    %8 = vector.multi_reduction <add>, %7, %cst_2 [1] : vector<16x32xf32> to vector<16xf32>
    %9 = vector.shape_cast %8 : vector<16xf32> to vector<16x1xf32>
    %cst_3 = arith.constant 3.200000e+01 : f32
    %10 = vector.broadcast %cst_3 : f32 to vector<16x1xf32>
    %11 = arith.divf %9, %10 : vector<16x1xf32>
    %12 = vector.broadcast %4 : vector<16x1xf32> to vector<16x32xf32>
    %13 = arith.subf %0, %12 : vector<16x32xf32>
    %cst_4 = arith.constant 9.99999974E-6 : f32
    %14 = vector.broadcast %cst_4 : f32 to vector<16x1xf32>
    %15 = arith.addf %11, %14 : vector<16x1xf32>
    %16 = math.rsqrt %15 : vector<16x1xf32>
    %17 = vector.broadcast %16 : vector<16x1xf32> to vector<16x32xf32>
    %18 = arith.mulf %13, %17 : vector<16x32xf32>
    %c0_5 = arith.constant 0 : index
    %c0_6 = arith.constant 0 : index
    %19 = vector.load %arg3[%c0_5, %c0_6] : memref<1x32xf32, #tpu.memory_space<vmem>>, vector<1x32xf32>
    %20 = vector.broadcast %19 : vector<1x32xf32> to vector<16x32xf32>
    %21 = arith.mulf %18, %20 : vector<16x32xf32>
    %c0_7 = arith.constant 0 : index
    %c0_8 = arith.constant 0 : index
    %22 = vector.load %arg4[%c0_7, %c0_8] : memref<1x32xf32, #tpu.memory_space<vmem>>, vector<1x32xf32>
    %23 = vector.broadcast %22 : vector<1x32xf32> to vector<16x32xf32>
    %24 = arith.addf %21, %23 : vector<16x32xf32>
    %25 = arith.truncf %24 : vector<16x32xf32> to vector<16x32xbf16>
    %c0_9 = arith.constant 0 : index
    %c0_10 = arith.constant 0 : index
    %26 = vector.load %arg5[%c0_9, %c0_10] : memref<32x64xbf16, #tpu.memory_space<vmem>>, vector<32x64xbf16>
    %cst_11 = arith.constant dense<0.000000e+00> : vector<16x64xf32>
    %27 = tpu.matmul %25, %26, %cst_11 {dimension_numbers = #tpu.dot_dimension_numbers<[1], [0], [0], [1], [0, 0, 1, 1], [], []>} : vector<16x32xbf16>, vector<32x64xbf16>, vector<16x64xf32> -> vector<16x64xf32>
    %c0_12 = arith.constant 0 : index
    %c0_13 = arith.constant 0 : index
    %28 = vector.load %arg6[%c0_12, %c0_13] : memref<1x64xf32, #tpu.memory_space<vmem>>, vector<1x64xf32>
    %29 = vector.broadcast %28 : vector<1x64xf32> to vector<16x64xf32>
    %30 = arith.addf %27, %29 : vector<16x64xf32>
    %cst_14 = arith.constant 5.000000e-01 : f32
    %31 = vector.broadcast %cst_14 : f32 to vector<16x64xf32>
    %32 = arith.mulf %31, %30 : vector<16x64xf32>
    %cst_15 = arith.constant 4.471500e-02 : f32
    %33 = vector.broadcast %cst_15 : f32 to vector<16x64xf32>
    %34 = arith.mulf %33, %30 : vector<16x64xf32>
    %35 = arith.mulf %34, %30 : vector<16x64xf32>
    %36 = arith.mulf %35, %30 : vector<16x64xf32>
    %37 = arith.addf %30, %36 : vector<16x64xf32>
    %cst_16 = arith.constant 0.797884583 : f32
    %38 = vector.broadcast %cst_16 : f32 to vector<16x64xf32>
    %39 = arith.mulf %38, %37 : vector<16x64xf32>
    %40 = math.tanh %39 : vector<16x64xf32>
    %cst_17 = arith.constant 1.000000e+00 : f32
    %41 = vector.broadcast %cst_17 : f32 to vector<16x64xf32>
    %42 = arith.addf %41, %40 : vector<16x64xf32>
    %43 = arith.mulf %32, %42 : vector<16x64xf32>
    %c0_18 = arith.constant 0 : index
    %c0_19 = arith.constant 0 : index
    %44 = vector.load %arg7[%c0_18, %c0_19] : memref<16x64xf32, #tpu.memory_space<vmem>>, vector<16x64xf32>
    tpu.vector_store %arg7[%c0_18, %c0_19], %43 {strides = array<i32>} : memref<16x64xf32, #tpu.memory_space<vmem>>, vector<16x64xf32>,
    return
  }
  func.func @transform_0(%arg0: i32, %arg1: i32) -> (i32, i32) {
    %c0_i32 = arith.constant 0 : i32
    %c0_i32_0 = arith.constant 0 : i32
    return %arg0, %c0_i32 : i32, i32
  }
  func.func @transform_1(%arg0: i32, %arg1: i32) -> (i32, i32) {
    %c0_i32 = arith.constant 0 : i32
    %c0_i32_0 = arith.constant 0 : i32
    %c0_i32_1 = arith.constant 0 : i32
    return %c0_i32, %c0_i32_0 : i32, i32
  }
  func.func @transform_2(%arg0: i32, %arg1: i32) -> (i32, i32) {
    %c0_i32 = arith.constant 0 : i32
    %c0_i32_0 = arith.constant 0 : i32
    %c0_i32_1 = arith.constant 0 : i32
    return %c0_i32, %c0_i32_0 : i32, i32
  }
  func.func @transform_3(%arg0: i32, %arg1: i32) -> (i32, i32) {
    %c0_i32 = arith.constant 0 : i32
    %c0_i32_0 = arith.constant 0 : i32
    return %c0_i32, %arg1 : i32, i32
  }
  func.func @transform_4(%arg0: i32, %arg1: i32) -> (i32, i32) {
    %c0_i32 = arith.constant 0 : i32
    %c0_i32_0 = arith.constant 0 : i32
    return %c0_i32, %arg1 : i32, i32
  }
  func.func @transform_5(%arg0: i32, %arg1: i32) -> (i32, i32) {
    %c0_i32 = arith.constant 0 : i32
    return %arg0, %arg1 : i32, i32
  }
}

module attributes {stable_mosaic.version = 11 : i64} {
  func.func @_matmul_residual_kernel(%arg0: i32, %arg1: i32, %arg2: memref<16x64xf32, #tpu.memory_space<vmem>>, %arg3: memref<64x32xbf16, #tpu.memory_space<vmem>>, %arg4: memref<1x32xf32, #tpu.memory_space<vmem>>, %arg5: memref<16x32xf32, #tpu.memory_space<vmem>>, %arg6: memref<16x32xf32, #tpu.memory_space<vmem>>) attributes {dimension_semantics = [#tpu.dimension_semantics<parallel>, #tpu.dimension_semantics<parallel>], iteration_bounds = array<i64: 1, 1>, scalar_prefetch = 0 : i64, scratch_operands = 0 : i64, tpu.core_type = #tpu.core_type<tc>, window_params = [{transform_indices = @transform_0, window_bounds = array<i64: 16, 64>}, {transform_indices = @transform_1, window_bounds = array<i64: 64, 32>}, {transform_indices = @transform_2, window_bounds = array<i64: 1, 32>}, {transform_indices = @transform_3, window_bounds = array<i64: 16, 32>}, {transform_indices = @transform_4, window_bounds = array<i64: 16, 32>}]} {
    %c0 = arith.constant 0 : index
    %c0_0 = arith.constant 0 : index
    %0 = vector.load %arg5[%c0, %c0_0] : memref<16x32xf32, #tpu.memory_space<vmem>>, vector<16x32xf32>
    %c0_1 = arith.constant 0 : index
    %c0_2 = arith.constant 0 : index
    %1 = vector.load %arg4[%c0_1, %c0_2] : memref<1x32xf32, #tpu.memory_space<vmem>>, vector<1x32xf32>
    %2 = vector.broadcast %1 : vector<1x32xf32> to vector<16x32xf32>
    %3 = arith.addf %0, %2 : vector<16x32xf32>
    %c0_3 = arith.constant 0 : index
    %c0_4 = arith.constant 0 : index
    %4 = vector.load %arg2[%c0_3, %c0_4] : memref<16x64xf32, #tpu.memory_space<vmem>>, vector<16x64xf32>
    %5 = arith.truncf %4 : vector<16x64xf32> to vector<16x64xbf16>
    %c0_5 = arith.constant 0 : index
    %c0_6 = arith.constant 0 : index
    %6 = vector.load %arg3[%c0_5, %c0_6] : memref<64x32xbf16, #tpu.memory_space<vmem>>, vector<64x32xbf16>
    %cst = arith.constant dense<0.000000e+00> : vector<16x32xf32>
    %7 = tpu.matmul %5, %6, %cst {dimension_numbers = #tpu.dot_dimension_numbers<[1], [0], [0], [1], [0, 0, 1, 1], [], []>} : vector<16x64xbf16>, vector<64x32xbf16>, vector<16x32xf32> -> vector<16x32xf32>
    %8 = arith.addf %3, %7 : vector<16x32xf32>
    %c0_7 = arith.constant 0 : index
    %c0_8 = arith.constant 0 : index
    %9 = vector.load %arg6[%c0_7, %c0_8] : memref<16x32xf32, #tpu.memory_space<vmem>>, vector<16x32xf32>
    tpu.vector_store %arg6[%c0_7, %c0_8], %8 {strides = array<i32>} : memref<16x32xf32, #tpu.memory_space<vmem>>, vector<16x32xf32>,
    return
  }
  func.func @transform_0(%arg0: i32, %arg1: i32) -> (i32, i32) {
    %c0_i32 = arith.constant 0 : i32
    %c0_i32_0 = arith.constant 0 : i32
    return %arg0, %c0_i32 : i32, i32
  }
  func.func @transform_1(%arg0: i32, %arg1: i32) -> (i32, i32) {
    %c0_i32 = arith.constant 0 : i32
    %c0_i32_0 = arith.constant 0 : i32
    return %c0_i32, %arg1 : i32, i32
  }
  func.func @transform_2(%arg0: i32, %arg1: i32) -> (i32, i32) {
    %c0_i32 = arith.constant 0 : i32
    %c0_i32_0 = arith.constant 0 : i32
    return %c0_i32, %arg1 : i32, i32
  }
  func.func @transform_3(%arg0: i32, %arg1: i32) -> (i32, i32) {
    %c0_i32 = arith.constant 0 : i32
    return %arg0, %arg1 : i32, i32
  }
  func.func @transform_4(%arg0: i32, %arg1: i32) -> (i32, i32) {
    %c0_i32 = arith.constant 0 : i32
    return %arg0, %arg1 : i32, i32
  }
}

module attributes {stable_mosaic.version = 11 : i64} {
  func.func @_ln_decode_kernel(%arg0: i32, %arg1: i32, %arg2: memref<16x32xf32, #tpu.memory_space<vmem>>, %arg3: memref<1x32xf32, #tpu.memory_space<vmem>>, %arg4: memref<1x32xf32, #tpu.memory_space<vmem>>, %arg5: memref<128x32xbf16, #tpu.memory_space<vmem>>, %arg6: memref<16x128xf32, #tpu.memory_space<vmem>>) attributes {dimension_semantics = [#tpu.dimension_semantics<parallel>, #tpu.dimension_semantics<parallel>], iteration_bounds = array<i64: 1, 1>, scalar_prefetch = 0 : i64, scratch_operands = 0 : i64, tpu.core_type = #tpu.core_type<tc>, window_params = [{transform_indices = @transform_0, window_bounds = array<i64: 16, 32>}, {pipeline_mode = #tpu.pipeline_mode<synchronous>, transform_indices = @transform_1, window_bounds = array<i64: 1, 32>}, {pipeline_mode = #tpu.pipeline_mode<synchronous>, transform_indices = @transform_2, window_bounds = array<i64: 1, 32>}, {transform_indices = @transform_3, window_bounds = array<i64: 128, 32>}, {transform_indices = @transform_4, window_bounds = array<i64: 16, 128>}]} {
    %c0 = arith.constant 0 : index
    %c0_0 = arith.constant 0 : index
    %0 = vector.load %arg2[%c0, %c0_0] : memref<16x32xf32, #tpu.memory_space<vmem>>, vector<16x32xf32>
    %cst = arith.constant dense<0.000000e+00> : vector<16xf32>
    %1 = vector.multi_reduction <add>, %0, %cst [1] : vector<16x32xf32> to vector<16xf32>
    %2 = vector.shape_cast %1 : vector<16xf32> to vector<16x1xf32>
    %cst_1 = arith.constant 3.200000e+01 : f32
    %3 = vector.broadcast %cst_1 : f32 to vector<16x1xf32>
    %4 = arith.divf %2, %3 : vector<16x1xf32>
    %5 = vector.broadcast %4 : vector<16x1xf32> to vector<16x32xf32>
    %6 = arith.subf %0, %5 : vector<16x32xf32>
    %7 = arith.mulf %6, %6 : vector<16x32xf32>
    %cst_2 = arith.constant dense<0.000000e+00> : vector<16xf32>
    %8 = vector.multi_reduction <add>, %7, %cst_2 [1] : vector<16x32xf32> to vector<16xf32>
    %9 = vector.shape_cast %8 : vector<16xf32> to vector<16x1xf32>
    %cst_3 = arith.constant 3.200000e+01 : f32
    %10 = vector.broadcast %cst_3 : f32 to vector<16x1xf32>
    %11 = arith.divf %9, %10 : vector<16x1xf32>
    %12 = vector.broadcast %4 : vector<16x1xf32> to vector<16x32xf32>
    %13 = arith.subf %0, %12 : vector<16x32xf32>
    %cst_4 = arith.constant 9.99999974E-6 : f32
    %14 = vector.broadcast %cst_4 : f32 to vector<16x1xf32>
    %15 = arith.addf %11, %14 : vector<16x1xf32>
    %16 = math.rsqrt %15 : vector<16x1xf32>
    %17 = vector.broadcast %16 : vector<16x1xf32> to vector<16x32xf32>
    %18 = arith.mulf %13, %17 : vector<16x32xf32>
    %c0_5 = arith.constant 0 : index
    %c0_6 = arith.constant 0 : index
    %19 = vector.load %arg3[%c0_5, %c0_6] : memref<1x32xf32, #tpu.memory_space<vmem>>, vector<1x32xf32>
    %20 = vector.broadcast %19 : vector<1x32xf32> to vector<16x32xf32>
    %21 = arith.mulf %18, %20 : vector<16x32xf32>
    %c0_7 = arith.constant 0 : index
    %c0_8 = arith.constant 0 : index
    %22 = vector.load %arg4[%c0_7, %c0_8] : memref<1x32xf32, #tpu.memory_space<vmem>>, vector<1x32xf32>
    %23 = vector.broadcast %22 : vector<1x32xf32> to vector<16x32xf32>
    %24 = arith.addf %21, %23 : vector<16x32xf32>
    %25 = arith.truncf %24 : vector<16x32xf32> to vector<16x32xbf16>
    %c0_9 = arith.constant 0 : index
    %c0_10 = arith.constant 0 : index
    %26 = vector.load %arg5[%c0_9, %c0_10] : memref<128x32xbf16, #tpu.memory_space<vmem>>, vector<128x32xbf16>
    %cst_11 = arith.constant dense<0.000000e+00> : vector<16x128xf32>
    %27 = tpu.matmul %25, %26, %cst_11 {dimension_numbers = #tpu.dot_dimension_numbers<[1], [1], [0], [0], [0, 0, 1, 0], [], []>} : vector<16x32xbf16>, vector<128x32xbf16>, vector<16x128xf32> -> vector<16x128xf32>
    %c0_12 = arith.constant 0 : index
    %c0_13 = arith.constant 0 : index
    %28 = vector.load %arg6[%c0_12, %c0_13] : memref<16x128xf32, #tpu.memory_space<vmem>>, vector<16x128xf32>
    tpu.vector_store %arg6[%c0_12, %c0_13], %27 {strides = array<i32>} : memref<16x128xf32, #tpu.memory_space<vmem>>, vector<16x128xf32>,
    return
  }
  func.func @transform_0(%arg0: i32, %arg1: i32) -> (i32, i32) {
    %c0_i32 = arith.constant 0 : i32
    %c0_i32_0 = arith.constant 0 : i32
    return %arg0, %c0_i32 : i32, i32
  }
  func.func @transform_1(%arg0: i32, %arg1: i32) -> (i32, i32) {
    %c0_i32 = arith.constant 0 : i32
    %c0_i32_0 = arith.constant 0 : i32
    %c0_i32_1 = arith.constant 0 : i32
    return %c0_i32, %c0_i32_0 : i32, i32
  }
  func.func @transform_2(%arg0: i32, %arg1: i32) -> (i32, i32) {
    %c0_i32 = arith.constant 0 : i32
    %c0_i32_0 = arith.constant 0 : i32
    %c0_i32_1 = arith.constant 0 : i32
    return %c0_i32, %c0_i32_0 : i32, i32
  }
  func.func @transform_3(%arg0: i32, %arg1: i32) -> (i32, i32) {
    %c0_i32 = arith.constant 0 : i32
    %c0_i32_0 = arith.constant 0 : i32
    return %arg1, %c0_i32 : i32, i32
  }
  func.func @transform_4(%arg0: i32, %arg1: i32) -> (i32, i32) {
    %c0_i32 = arith.constant 0 : i32
    return %arg0, %arg1 : i32, i32
  }
}

module attributes {stable_mosaic.version = 11 : i64} {
  func.func @_softmax_argmax_kernel(%arg0: i32, %arg1: memref<16x128xf32, #tpu.memory_space<vmem>>, %arg2: memref<16x128xf32, #tpu.memory_space<vmem>>, %arg3: memref<16x1xi32, #tpu.memory_space<vmem>>) attributes {dimension_semantics = [#tpu.dimension_semantics<parallel>], iteration_bounds = array<i64: 1>, scalar_prefetch = 0 : i64, scratch_operands = 0 : i64, tpu.core_type = #tpu.core_type<tc>, window_params = [{transform_indices = @transform_0, window_bounds = array<i64: 16, 128>}, {transform_indices = @transform_1, window_bounds = array<i64: 16, 128>}, {transform_indices = @transform_2, window_bounds = array<i64: 16, 1>}]} {
    %c0 = arith.constant 0 : index
    %c0_0 = arith.constant 0 : index
    %0 = vector.load %arg1[%c0, %c0_0] : memref<16x128xf32, #tpu.memory_space<vmem>>, vector<16x128xf32>
    %cst = arith.constant dense<0xFF800000> : vector<16xf32>
    %1 = vector.multi_reduction <maximumf>, %0, %cst [1] : vector<16x128xf32> to vector<16xf32>
    %2 = vector.shape_cast %1 : vector<16xf32> to vector<16x1xf32>
    %3 = vector.broadcast %2 : vector<16x1xf32> to vector<16x128xf32>
    %4 = arith.subf %0, %3 : vector<16x128xf32>
    %5 = math.exp %4 : vector<16x128xf32>
    %cst_1 = arith.constant dense<0.000000e+00> : vector<16xf32>
    %6 = vector.multi_reduction <add>, %5, %cst_1 [1] : vector<16x128xf32> to vector<16xf32>
    %7 = vector.shape_cast %6 : vector<16xf32> to vector<16x1xf32>
    %8 = vector.broadcast %7 : vector<16x1xf32> to vector<16x128xf32>
    %9 = arith.divf %5, %8 : vector<16x128xf32>
    %c0_2 = arith.constant 0 : index
    %c0_3 = arith.constant 0 : index
    %10 = vector.load %arg2[%c0_2, %c0_3] : memref<16x128xf32, #tpu.memory_space<vmem>>, vector<16x128xf32>
    tpu.vector_store %arg2[%c0_2, %c0_3], %9 {strides = array<i32>} : memref<16x128xf32, #tpu.memory_space<vmem>>, vector<16x128xf32>,
    %11 = tpu.iota {dimensions = array<i32: 1>} : vector<16x128xi32>
    %12 = vector.broadcast %2 : vector<16x1xf32> to vector<16x128xf32>
    %13 = arith.cmpf oeq, %0, %12 : vector<16x128xf32>
    %c128_i32 = arith.constant 128 : i32
    %14 = vector.broadcast %c128_i32 : i32 to vector<16x128xi32>
    %15 = arith.select %13, %11, %14 : vector<16x128xi1>, vector<16x128xi32>
    %cst_4 = arith.constant dense<2147483647> : vector<16xi32>
    %16 = vector.multi_reduction <minsi>, %15, %cst_4 [1] : vector<16x128xi32> to vector<16xi32>
    %17 = vector.shape_cast %16 : vector<16xi32> to vector<16x1xi32>
    %c0_5 = arith.constant 0 : index
    %c0_6 = arith.constant 0 : index
    %18 = vector.load %arg3[%c0_5, %c0_6] : memref<16x1xi32, #tpu.memory_space<vmem>>, vector<16x1xi32>
    tpu.vector_store %arg3[%c0_5, %c0_6], %17 {strides = array<i32>} : memref<16x1xi32, #tpu.memory_space<vmem>>, vector<16x1xi32>,
    return
  }
  func.func @transform_0(%arg0: i32) -> (i32, i32) {
    %c0_i32 = arith.constant 0 : i32
    %c0_i32_0 = arith.constant 0 : i32
    return %arg0, %c0_i32 : i32, i32
  }
  func.func @transform_1(%arg0: i32) -> (i32, i32) {
    %c0_i32 = arith.constant 0 : i32
    %c0_i32_0 = arith.constant 0 : i32
    return %arg0, %c0_i32 : i32, i32
  }
  func.func @transform_2(%arg0: i32) -> (i32, i32) {
    %c0_i32 = arith.constant 0 : i32
    %c0_i32_0 = arith.constant 0 : i32
    return %arg0, %c0_i32 : i32, i32
  }
}

</mosaic_0001>

<bundles_post_ra>
// kernel: gpt2_forward.14
= control target key start
LH: loop header
LB: loop body
LE: loop exit
PB: predicated region body
PF: predicated region fallthrough
CT: control target
= control target key end

     0   :  { %v120_v0 = vmov 0.0   ;;  %vm121_vm0 = vmmov 0   ;;  %vm48_vm1 = vcmask 261120   ;;  %s177_s1 = inlined_call_operand.vmem [shape: bf16[32,32], index: 1, kind: input, shape index: {}]   ;;  %s178_s0 = inlined_call_operand.vmem [shape: f32[16,32], index: 0, kind: input, shape index: {}]   ;;  %s179_s2 = inlined_call_operand.vmem [shape: f32[1,32], index: 2, kind: input, shape index: {}]   ;;  %s180_s3 = inlined_call_operand.vmem [shape: f32[16,32], index: 3, kind: input, shape index: {}]   ;;  %s181_s4 = inlined_call_operand.vmem [shape: f32[16,32], index: 4, kind: output, shape index: {}]  }
   0x1   :  { %108 = vmatprep.subr.bf16.mxu0 %v120_v0  ;;  %v118_v1 = vld [vmem:[%s177_s1] sm:$0xff]   ;;  %112 = vmatprep.mubr.msk.bf16.mxu0 %vm121_vm0, %v120_v0  ;;  %v119_v2 = vld [vmem:[%s177_s1 + $0x8] sm:$0xff]  }
   0x2   :  { %109 = vmatpush3.bf16.msra.mxu0 %v118_v1  ;;  %v29_v3 = vld [vmem:[%s178_s0] sm:$0xff]  ;;  %v30_v4 = vld [vmem:[%s178_s0 + $0x8] sm:$0xff] }
   0x3   :  { %110 = vmatprep.subr.bf16.mxu0 %v120_v0  ;;  %v31_v5 = vpack.c.bf16 %v30_v4, %v29_v3  ;;  %v18_v6 = vld [vmem:[%s180_s3] sm:$0xff]  ;;  %v19_v8 = vld [vmem:[%s180_s3 + $0x8] sm:$0xff] }
   0x4   :  { %v101_v7 = vld [vmem:[%s179_s2] ss:$0 sm:$0xff] }
   0x5   :  { %v27_v9 = vadd.f32 %v101_v7, %v18_v6  ;;  %v28_v10 = vadd.f32 %v101_v7, %v19_v8 }
   0x6   :  { %111 = vmatpush3.bf16.msra.mxu0 %v119_v2 }
   0x9   :  { %113 = vmatmul.mubr.msk.bf16.vlgmr.msra.gmra.mrb[0].mxu0 %vm48_vm1, %v31_v5 }
  0xdc   :  { %v86_v11 = vpop.f32.mrb[0].mxu0 }
  0xdd   :  { %v93_v12 = vadd.f32 %v86_v11, %v27_v9  ;;  %v114_v13 = vpop.f32.mrb[1].mxu0 }
  0xde   :  { %v89_v14 = vpop.f32.mrb[2].mxu0 }
  0xdf   :  { %95 = vst.msk [vmem:[%s181_s4] sm:$0xff] %vm48_vm1, %v93_v12  ;;  %v94_v15 = vadd.f32 %v89_v14, %v28_v10  ;;  %v115_v16 = vpop.f32.mrb[3].mxu0 }
  0xe1   :  { %96 = vst.msk [vmem:[%s181_s4 + $0x8] sm:$0xff] %vm48_vm1, %v94_v15 }

// kernel: gpt2_forward.12
= control target key start
LH: loop header
LB: loop body
LE: loop exit
PB: predicated region body
PF: predicated region fallthrough
CT: control target
= control target key end

     0   :  { %vm23_vm0 = vcmask 261120   ;;  %v169_v15 = vmov 0.0   ;;  %vm170_vm1 = vmmov 0   ;;  %vm137_vm2 = vcmask 785408   ;;  %s233_s0 = inlined_call_operand.vmem [shape: f32[16,32], index: 0, kind: input, shape index: {}]   ;;  %s234_s3 = inlined_call_operand.vmem [shape: bf16[32,96], index: 3, kind: input, shape index: {}]   ;;  %s235_s1 = inlined_call_operand.vmem [shape: f32[1,32], index: 1, kind: input, shape index: {}]   ;;  %s236_s2 = inlined_call_operand.vmem [shape: f32[1,32], index: 2, kind: input, shape index: {}]   ;;  %s237_s4 = inlined_call_operand.vmem [shape: f32[1,96], index: 4, kind: input, shape index: {}]   ;;  %s238_s5 = inlined_call_operand.vmem [shape: f32[16,96], index: 5, kind: output, shape index: {}]  }
   0x1   :  { %v21_v0 = vld [vmem:[%s233_s0] sm:$0xff]  ;;  %v22_v1 = vld [vmem:[%s233_s0 + $0x8] sm:$0xff]  ;;  %153 = vmatprep.subr.bf16.mxu0 %v169_v15  ;;  %157 = vmatprep.mubr.msk.bf16.mxu0 %vm170_vm1, %v169_v15 }
   0x2   :  { %v24_v2 = vsel %vm23_vm0, %v21_v0, 0.0  ;;  %v27_v3 = vsel %vm23_vm0, %v22_v1, 0.0  ;;  %v163_v14 = vld [vmem:[%s234_s3] sm:$0xff]   ;;  %v164_v16 = vld [vmem:[%s234_s3 + $0x8] sm:$0xff]  }
   0x3   :  { %25 = vadd.xlane.f32.xlu0 %v24_v2  ;;  %154 = vmatpush3.bf16.msra.mxu0 %v163_v14  ;;  %v144_v25 = vld [vmem:[%s235_s1] ss:$0 sm:$0xff] }
   0x4   :  { %155 = vmatprep.subr.bf16.mxu0 %v169_v15  ;;  %v145_v29 = vld [vmem:[%s236_s2] ss:$0 sm:$0xff] }
   0x5   :  { %v146_v34 = vld [vmem:[%s237_s4] ss:$0 sm:$0xff] }
   0x7   :  { %28 = vadd.xlane.f32.xlu0 %v27_v3  ;;  %156 = vmatpush3.bf16.msra.mxu0 %v164_v16 }
  0x90   :  { %v26_v4 = vpop.xlane.xlu0 %25 }
  0x91   :  { %v31_v5 = vmul.f32 0.03125, %v26_v4 }
  0x93   :  { %v33_v6 = vsub.f32 %v21_v0, %v31_v5 }
  0x94   :  { %v29_v7 = vpop.xlane.xlu0 %28 }
  0x95   :  { %v32_v8 = vmul.f32 0.03125, %v29_v7  ;;  %v35_v9 = vmul.f32 %v33_v6, %v33_v6 }
  0x97   :  { %v34_v10 = vsub.f32 %v22_v1, %v32_v8  ;;  %v37_v11 = vsel %vm23_vm0, %v35_v9, 0.0 }
  0x98   :  { %38 = vadd.xlane.f32.xlu1 %v37_v11 }
  0x99   :  { %v36_v12 = vmul.f32 %v34_v10, %v34_v10 }
  0x9b   :  { %v40_v13 = vsel %vm23_vm0, %v36_v12, 0.0 }
  0x9c   :  { %41 = vadd.xlane.f32.xlu1 %v40_v13 }
 0x125   :  { %v39_v17 = vpop.xlane.xlu1 %38 }
 0x126   :  { %v43_v18 = vmul.f32 0.03125, %v39_v17 }
 0x128   :  { %v45_v19 = vadd.f32 1e-05, %v43_v18 }
 0x129   :  { %v42_v20 = vpop.xlane.xlu1 %41 }
 0x12a   :  { %165 = vrsqrt.f32 %v45_v19  ;;  %v44_v21 = vmul.f32 0.03125, %v42_v20 }
 0x12c   :  { %v46_v22 = vadd.f32 1e-05, %v44_v21 }
 0x12e   :  { %167 = vrsqrt.f32 %v46_v22 }
 0x134   :  { %v166_v23 = vpop.eup %165 }
 0x135   :  { %v49_v24 = vmul.f32 %v166_v23, %v33_v6 }
 0x137   :  { %v58_v28 = vmul.f32 %v144_v25, %v49_v24 }
 0x138   :  { %v168_v26 = vpop.eup %167 }
 0x139   :  { %v50_v27 = vmul.f32 %v168_v26, %v34_v10  ;;  %v67_v31 = vadd.f32 %v145_v29, %v58_v28 }
 0x13b   :  { %v59_v30 = vmul.f32 %v144_v25, %v50_v27 }
 0x13d   :  { %v68_v32 = vadd.f32 %v145_v29, %v59_v30 }
 0x13f   :  { %v69_v33 = vpack.c.bf16 %v68_v32, %v67_v31 }
 0x141   :  { %158 = vmatmul.mubr.msk.bf16.vlgmr.msra.gmra.mrb[0].mxu0 %vm23_vm0, %v69_v33 }
 0x214   :  { %v130_v35 = vpop.f32.mrb[0].mxu0 }
 0x215   :  { %v131_v36 = vadd.f32 %v146_v34, %v130_v35  ;;  %v159_v37 = vpop.f32.mrb[1].mxu0 }
 0x216   :  { %v133_v38 = vpop.f32.mrb[2].mxu0 }
 0x217   :  { %138 = vst.msk [vmem:[%s238_s5] sm:$0xff] %vm137_vm2, %v131_v36  ;;  %v134_v39 = vadd.f32 %v146_v34, %v133_v38  ;;  %v160_v40 = vpop.f32.mrb[3].mxu0 }
 0x219   :  { %139 = vst.msk [vmem:[%s238_s5 + $0x8] sm:$0xff] %vm137_vm2, %v134_v39 }

// kernel: gpt2_forward.13
= control target key start
LH: loop header
LB: loop body
LE: loop exit
PB: predicated region body
PF: predicated region fallthrough
CT: control target
= control target key end

     0   :  { %s897_s12 = smov 0   ;;  %s978_s0 = inlined_call_operand.vmem [shape: f32[2,4,8,8], index: 0, kind: input, shape index: {}]   ;;  %s979_s1 = inlined_call_operand.vmem [shape: f32[2,4,8,8], index: 1, kind: input, shape index: {}]   ;;  %s980_s2 = inlined_call_operand.vmem [shape: f32[2,4,8,8], index: 2, kind: input, shape index: {}]   ;;  %s981_s3 = inlined_call_operand.vmem [shape: f32[2,4,8,8], index: 3, kind: output, shape index: {}]  }
   0x1 LB: > { %s750_s13 = sadd.s32 4294967295, %s873_s12   ;;  %p754_p0 = scmp.ge.s32.totalorder %s873_s12, 1  ;;  %s873_s12 = sphi %s897_s12, %s13_s12  }
   0x2   : > { %p157_p1 = scmp.lt.s32.totalorder %s873_s12, 3 }
   0x4   : > { %p158_p2 = pnand %p754_p0, %p157_p1 }
   0x5   : > { %p191_p3 = scmp.lt.s32.totalorder (!%p158_p2), %s750_s13, 1  ;;  %v875_v0 = vmov (!%p158_p2), 0.0   ;;  %vm876_vm0 = vmmov (!%p158_p2), 0   ;;  %vm240_vm1 = vcmask (!%p158_p2), 64512   ;;  %v425_v25 = vlaneseq (!%p158_p2) }
   0x6   : > { %161 = sbr.rel (%p158_p2) target bundleno = 783 (0x30f), region = 32  ;;  %793 = vmatprep.subr.bf16.mxu0 (!%p158_p2), %v875_v0  ;;  %799 = vmatprep.subr.bf16.mxu1 (!%p158_p2), %v875_v0  ;;  %vm485_vm3 = vcmask (!%p158_p2), 1043456  }
   0x7   : > { %795 = vmatprep.mubr.msk.bf16.mxu0 (!%p158_p2), %vm876_vm0, %v875_v0  ;;  %801 = vmatprep.mubr.msk.bf16.mxu1 (!%p158_p2), %vm876_vm0, %v875_v0  ;;  %v426_v26 = vshrl.u32 (!%p158_p2), %v425_v25, 7  ;;  %v428_v27 = vand.u32 (!%p158_p2), 127, %v425_v25 }
   0x9   : > { %vm429_vm2 = vcmp.ge.s32.totalorder (!%p158_p2), %v426_v26, %v428_v27 }
   0xd   : > { %s983_s13 = smov (!%p191_p3, %s750_s13), 1 }
   0xe   : > { %s911_s14 = sshll.u32 %s983_s13, 5 }
   0xf   : > { %s200_s17 = scalar_lea.vmem %s979_s1, %s911_s14  ;;  %s195_s20 = scalar_lea.vmem %s978_s0, %s911_s14 }
  0x10   : > { %v224_v1 = vld [vmem:[%s200_s17] sm:$0xff]  ;;  %v225_v2 = vld [vmem:[%s200_s17 + $0x8] sm:$0xff]  ;;  %v226_v7 = vld [vmem:[%s200_s17 + $0x10] sm:$0xff]  ;;  %s205_s23 = scalar_lea.vmem %s980_s2, %s911_s14  ;;  %s210_s26 = scalar_lea.vmem %s981_s3, %s911_s14 }
  0x11   : > { %v212_v3 = vld [vmem:[%s195_s20] sm:$0xff]  ;;  %v228_v4 = vpack.c.bf16 %v224_v1, %v224_v1  ;;  %v229_v5 = vpack.c.bf16 %v225_v2, %v225_v2  ;;  %v213_v6 = vld [vmem:[%s195_s20 + $0x8] sm:$0xff]  ;;  %v227_v8 = vld [vmem:[%s200_s17 + $0x18] sm:$0xff]  ;;  %v230_v13 = vpack.c.bf16 %v226_v7, %v226_v7 }
  0x12   : > { %v216_v11 = vmul.f32 0.35355338, %v212_v3  ;;  %v217_v12 = vmul.f32 0.35355338, %v213_v6  ;;  %v231_v14 = vpack.c.bf16 %v227_v8, %v227_v8  ;;  %v214_v17 = vld [vmem:[%s195_s20 + $0x10] sm:$0xff]  ;;  %v215_v18 = vld [vmem:[%s195_s20 + $0x18] sm:$0xff] }
  0x13   : > { %v245_v9 = vsel %vm240_vm1, %v228_v4, 0  ;;  %v291_v10 = vsel %vm240_vm1, %v229_v5, 0  ;;  %v337_v19 = vsel %vm240_vm1, %v230_v13, 0  ;;  %v218_v21 = vmul.f32 0.35355338, %v214_v17 }
  0x14   : > { %794 = vmatpush3.bf16.xpose.msra.mxu0 %v245_v9  ;;  %800 = vmatpush3.bf16.xpose.msra.mxu1 %v291_v10  ;;  %v220_v15 = vpack.c.bf16 %v216_v11, %v216_v11  ;;  %v221_v16 = vpack.c.bf16 %v217_v12, %v217_v12  ;;  %v383_v20 = vsel %vm240_vm1, %v231_v14, 0  ;;  %v219_v22 = vmul.f32 0.35355338, %v215_v18  ;;  %v232_v9 = vld [vmem:[%s205_s23] sm:$0xff]  ;;  %v233_v12 = vld [vmem:[%s205_s23 + $0x8] sm:$0xff]  ;;  %v235_v18 = vld [vmem:[%s205_s23 + $0x18] sm:$0xff] }
  0x15   : > { %805 = vmatprep.subr.bf16.mxu0 %v875_v0  ;;  %811 = vmatprep.subr.bf16.mxu1 %v875_v0  ;;  %v222_v23 = vpack.c.bf16 %v218_v21, %v218_v21  ;;  %v236_v10 = vpack.c.bf16 %v232_v9, %v232_v9  ;;  %v237_v13 = vpack.c.bf16 %v233_v12, %v233_v12 }
  0x16   : > { %v223_v24 = vpack.c.bf16 %v219_v22, %v219_v22 }
  0x17   : > { %v487_v11 = vsel %vm485_vm3, %v236_v10, 0  ;;  %v533_v14 = vsel %vm485_vm3, %v237_v13, 0 }
  0x1b   : > { %796 = vmatmul.mubr.msk.bf16.vlgmr.msra.gmra.mrb[0].mxu0 %vm240_vm1, %v220_v15  ;;  %802 = vmatmul.mubr.msk.bf16.vlgmr.msra.gmra.mrb[0].mxu1 %vm240_vm1, %v221_v16  ;;  %v234_v15 = vld [vmem:[%s205_s23 + $0x10] sm:$0xff] }
  0x1c   : > { %806 = vmatpush3.bf16.xpose.msra.mxu0 %v337_v19  ;;  %812 = vmatpush3.bf16.xpose.msra.mxu1 %v383_v20  ;;  %v238_v16 = vpack.c.bf16 %v234_v15, %v234_v15  ;;  %v239_v19 = vpack.c.bf16 %v235_v18, %v235_v18 }
  0x1d   : > { %807 = vmatprep.mubr.msk.bf16.mxu0 %vm876_vm0, %v875_v0  ;;  %813 = vmatprep.mubr.msk.bf16.mxu1 %vm876_vm0, %v875_v0 }
  0x1e   : > { %817 = vmatprep.subr.bf16.mxu0 %v875_v0  ;;  %823 = vmatprep.subr.bf16.mxu1 %v875_v0  ;;  %v579_v17 = vsel %vm485_vm3, %v238_v16, 0  ;;  %v625_v20 = vsel %vm485_vm3, %v239_v19, 0 }
  0x23   : > { %808 = vmatmul.mubr.msk.bf16.vlgmr.msra.gmra.mrb[4].mxu0 %vm240_vm1, %v222_v23  ;;  %814 = vmatmul.mubr.msk.bf16.vlgmr.msra.gmra.mrb[4].mxu1 %vm240_vm1, %v223_v24 }
  0x24   : > { %819 = vmatprep.mubr.msk.bf16.mxu0 %vm876_vm0, %v875_v0  ;;  %825 = vmatprep.mubr.msk.bf16.mxu1 %vm876_vm0, %v875_v0 }
  0x25   : > { %818 = vmatpush3.bf16.msra.mxu0 %v487_v11  ;;  %824 = vmatpush3.bf16.msra.mxu1 %v533_v14 }
  0x26   : > { %829 = vmatprep.subr.bf16.mxu0 %v875_v0  ;;  %835 = vmatprep.subr.bf16.mxu1 %v875_v0 }
  0xee   : > { %v281_v28 = vpop.f32.mrb[0].mxu0  ;;  %v327_v29 = vpop.f32.mrb[0].mxu1 }
  0xef   : > { %v430_v30 = vsel %vm429_vm2, %v281_v28, -1e+09  ;;  %v797_v31 = vpop.f32.mrb[1].mxu0  ;;  %v431_v32 = vsel %vm429_vm2, %v327_v29, -1e+09  ;;  %v803_v33 = vpop.f32.mrb[1].mxu1 }
  0xf0   : > { %v284_v34 = vpop.f32.mrb[2].mxu0  ;;  %v434_v35 = vsel %vm240_vm1, %v430_v30, -inf  ;;  %v330_v36 = vpop.f32.mrb[2].mxu1  ;;  %v437_v39 = vsel %vm240_vm1, %v431_v32, -inf }
  0xf1   : > { %435 = vmax.xlane.f32.xlu0 %v434_v35  ;;  %v798_v37 = vpop.f32.mrb[3].mxu0  ;;  %v804_v38 = vpop.f32.mrb[3].mxu1 }
  0xf5   : > { %438 = vmax.xlane.f32.xlu0 %v437_v39 }
  0xf6   : > { %v373_v40 = vpop.f32.mrb[4].mxu0  ;;  %v419_v41 = vpop.f32.mrb[4].mxu1 }
  0xf7   : > { %v432_v42 = vsel %vm429_vm2, %v373_v40, -1e+09  ;;  %v809_v43 = vpop.f32.mrb[5].mxu0  ;;  %v433_v44 = vsel %vm429_vm2, %v419_v41, -1e+09  ;;  %v815_v45 = vpop.f32.mrb[5].mxu1 }
  0xf8   : > { %v376_v46 = vpop.f32.mrb[6].mxu0  ;;  %v440_v47 = vsel %vm240_vm1, %v432_v42, -inf  ;;  %v422_v48 = vpop.f32.mrb[6].mxu1  ;;  %v443_v51 = vsel %vm240_vm1, %v433_v44, -inf }
  0xf9   : > { %441 = vmax.xlane.f32.xlu1 %v440_v47  ;;  %v810_v49 = vpop.f32.mrb[7].mxu0  ;;  %v816_v50 = vpop.f32.mrb[7].mxu1 }
  0xfd   : > { %444 = vmax.xlane.f32.xlu1 %v443_v51 }
 0x17e   : > { %v436_v52 = vpop.xlane.xlu0 %435 }
 0x17f   : > { %v446_v53 = vsub.f32 %v430_v30, %v436_v52 }
 0x181   : > { %v450_v54 = vmul.f32 1.442695, %v446_v53 }
 0x182   : > { %v439_v55 = vpop.xlane.xlu0 %438 }
 0x183   : > { %851 = vpow2.f32 %v450_v54  ;;  %v447_v56 = vsub.f32 %v431_v32, %v439_v55 }
 0x185   : > { %v452_v57 = vmul.f32 1.442695, %v447_v56 }
 0x186   : > { %v442_v58 = vpop.xlane.xlu1 %441 }
 0x187   : > { %853 = vpow2.f32 %v452_v57  ;;  %v448_v59 = vsub.f32 %v432_v42, %v442_v58 }
 0x189   : > { %v454_v60 = vmul.f32 1.442695, %v448_v59 }
 0x18a   : > { %v445_v61 = vpop.xlane.xlu1 %444 }
 0x18b   : > { %855 = vpow2.f32 %v454_v60  ;;  %v449_v62 = vsub.f32 %v433_v44, %v445_v61 }
 0x18d   : > { %v852_v63 = vpop.eup %851  ;;  %v456_v1 = vmul.f32 1.442695, %v449_v62 }
 0x18e   : > { %v458_v2 = vsel %vm240_vm1, %v852_v63, 0.0 }
 0x18f   : > { %857 = vpow2.f32 %v456_v1  ;;  %459 = vadd.xlane.f32.xlu0 %v458_v2 }
 0x191   : > { %v854_v3 = vpop.eup %853 }
 0x192   : > { %v461_v4 = vsel %vm240_vm1, %v854_v3, 0.0 }
 0x193   : > { %462 = vadd.xlane.f32.xlu1 %v461_v4 }
 0x195   : > { %v856_v5 = vpop.eup %855 }
 0x196   : > { %v464_v6 = vsel %vm240_vm1, %v856_v5, 0.0 }
 0x197   : > { %465 = vadd.xlane.f32.xlu0 %v464_v6 }
 0x199   : > { %v858_v7 = vpop.eup %857 }
 0x19a   : > { %v467_v8 = vsel %vm240_vm1, %v858_v7, 0.0 }
 0x19b   : > { %468 = vadd.xlane.f32.xlu1 %v467_v8 }
 0x21c   : > { %v460_v21 = vpop.xlane.xlu0 %459 }
 0x21d   : > { %859 = vrcp.f32 %v460_v21 }
 0x220   : > { %v463_v22 = vpop.xlane.xlu1 %462 }
 0x221   : > { %861 = vrcp.f32 %v463_v22 }
 0x224   : > { %v466_v23 = vpop.xlane.xlu0 %465 }
 0x225   : > { %863 = vrcp.f32 %v466_v23 }
 0x227   : > { %v860_v24 = vpop.eup %859 }
 0x228   : > { %v471_v25 = vmul.f32 %v860_v24, %v852_v63  ;;  %v469_v26 = vpop.xlane.xlu1 %468 }
 0x229   : > { %865 = vrcp.f32 %v469_v26 }
 0x22a   : > { %v478_v27 = vpack.c.bf16 %v471_v25, %v471_v25 }
 0x22b   : > { %v862_v28 = vpop.eup %861 }
 0x22c   : > { %v473_v29 = vmul.f32 %v862_v28, %v854_v3  ;;  %820 = vmatmul.mubr.msk.bf16.vlgmr.msra.gmra.mrb[8].mxu0 %vm240_vm1, %v478_v27 }
 0x22d   : > { %830 = vmatpush3.bf16.msra.mxu0 %v579_v17  ;;  %831 = vmatprep.mubr.msk.bf16.mxu0 %vm876_vm0, %v875_v0 }
 0x22e   : > { %v479_v30 = vpack.c.bf16 %v473_v29, %v473_v29 }
 0x22f   : > { %v864_v31 = vpop.eup %863 }
 0x230   : > { %v475_v32 = vmul.f32 %v864_v31, %v856_v5  ;;  %826 = vmatmul.mubr.msk.bf16.vlgmr.msra.gmra.mrb[8].mxu1 %vm240_vm1, %v479_v30 }
 0x231   : > { %836 = vmatpush3.bf16.msra.mxu1 %v625_v20  ;;  %837 = vmatprep.mubr.msk.bf16.mxu1 %vm876_vm0, %v875_v0 }
 0x232   : > { %v480_v33 = vpack.c.bf16 %v475_v32, %v475_v32 }
 0x233   : > { %v866_v34 = vpop.eup %865 }
 0x234   : > { %v477_v35 = vmul.f32 %v866_v34, %v858_v7  ;;  %832 = vmatmul.mubr.msk.bf16.vlgmr.msra.gmra.mrb[12].mxu0 %vm240_vm1, %v480_v33 }
 0x236   : > { %v481_v36 = vpack.c.bf16 %v477_v35, %v477_v35 }
 0x238   : > { %838 = vmatmul.mubr.msk.bf16.vlgmr.msra.gmra.mrb[12].mxu1 %vm240_vm1, %v481_v36 }
 0x2ff   : > { %v523_v37 = vpop.f32.mrb[8].mxu0 }
 0x300   : > { %667 = vst.msk [vmem:[%s210_s26] sm:$0xff] %vm240_vm1, %v523_v37  ;;  %v821_v38 = vpop.f32.mrb[9].mxu0 }
 0x301   : > { %v526_v39 = vpop.f32.mrb[10].mxu0 }
 0x302   : > { %v822_v40 = vpop.f32.mrb[11].mxu0 }
 0x303   : > { %v569_v41 = vpop.f32.mrb[8].mxu1 }
 0x304   : > { %668 = vst.msk [vmem:[%s210_s26 + $0x8] sm:$0xff] %vm240_vm1, %v569_v41  ;;  %v827_v0 = vpop.f32.mrb[9].mxu1 }
 0x305   : > { %v572_v42 = vpop.f32.mrb[10].mxu1 }
 0x306   : > { %v828_v43 = vpop.f32.mrb[11].mxu1 }
 0x307   : > { %v615_v44 = vpop.f32.mrb[12].mxu0 }
 0x308   : > { %669 = vst.msk [vmem:[%s210_s26 + $0x10] sm:$0xff] %vm240_vm1, %v615_v44  ;;  %v833_v45 = vpop.f32.mrb[13].mxu0 }
 0x309   : > { %v618_v46 = vpop.f32.mrb[14].mxu0 }
 0x30a   : > { %v834_v47 = vpop.f32.mrb[15].mxu0 }
 0x30b   : > { %v661_v48 = vpop.f32.mrb[12].mxu1 }
 0x30c   : > { %670 = vst.msk [vmem:[%s210_s26 + $0x18] sm:$0xff] %vm240_vm1, %v661_v48  ;;  %v839_v49 = vpop.f32.mrb[13].mxu1 }
 0x30d   : > { %v664_v50 = vpop.f32.mrb[14].mxu1 }
 0x30e   : > { %v840_v51 = vpop.f32.mrb[15].mxu1 }
 0x30f PF: > { %s13_s12 = sadd.s32 1, %s873_s12  }
 0x310   : > { %p10_p4 = scmp.ge.s32.totalorder %s13_s12, 4  }
 0x312   :  { %12 = sbr.rel (!%p10_p4) target bundleno = 1 (0x1), region = 68 }

// kernel: gpt2_forward.15
= control target key start
LH: loop header
LB: loop body
LE: loop exit
PB: predicated region body
PF: predicated region fallthrough
CT: control target
= control target key end

     0   :  { %vm23_vm0 = vcmask 261120   ;;  %v191_v15 = vmov 0.0   ;;  %vm192_vm1 = vmmov 0   ;;  %vm155_vm2 = vcmask 523264   ;;  %s255_s0 = inlined_call_operand.vmem [shape: f32[16,32], index: 0, kind: input, shape index: {}]   ;;  %s256_s3 = inlined_call_operand.vmem [shape: bf16[32,64], index: 3, kind: input, shape index: {}]   ;;  %s257_s1 = inlined_call_operand.vmem [shape: f32[1,32], index: 1, kind: input, shape index: {}]   ;;  %s258_s2 = inlined_call_operand.vmem [shape: f32[1,32], index: 2, kind: input, shape index: {}]   ;;  %s259_s4 = inlined_call_operand.vmem [shape: f32[1,64], index: 4, kind: input, shape index: {}]   ;;  %s260_s5 = inlined_call_operand.vmem [shape: f32[16,64], index: 5, kind: output, shape index: {}]  }
   0x1   :  { %v21_v0 = vld [vmem:[%s255_s0] sm:$0xff]  ;;  %v22_v1 = vld [vmem:[%s255_s0 + $0x8] sm:$0xff]  ;;  %171 = vmatprep.subr.bf16.mxu0 %v191_v15  ;;  %175 = vmatprep.mubr.msk.bf16.mxu0 %vm192_vm1, %v191_v15 }
   0x2   :  { %v24_v2 = vsel %vm23_vm0, %v21_v0, 0.0  ;;  %v27_v3 = vsel %vm23_vm0, %v22_v1, 0.0  ;;  %v181_v14 = vld [vmem:[%s256_s3] sm:$0xff]   ;;  %v182_v16 = vld [vmem:[%s256_s3 + $0x8] sm:$0xff]  }
   0x3   :  { %25 = vadd.xlane.f32.xlu0 %v24_v2  ;;  %172 = vmatpush3.bf16.msra.mxu0 %v181_v14  ;;  %v162_v25 = vld [vmem:[%s257_s1] ss:$0 sm:$0xff] }
   0x4   :  { %173 = vmatprep.subr.bf16.mxu0 %v191_v15  ;;  %v163_v29 = vld [vmem:[%s258_s2] ss:$0 sm:$0xff] }
   0x5   :  { %v164_v34 = vld [vmem:[%s259_s4] ss:$0 sm:$0xff] }
   0x7   :  { %28 = vadd.xlane.f32.xlu0 %v27_v3  ;;  %174 = vmatpush3.bf16.msra.mxu0 %v182_v16 }
  0x90   :  { %v26_v4 = vpop.xlane.xlu0 %25 }
  0x91   :  { %v31_v5 = vmul.f32 0.03125, %v26_v4 }
  0x93   :  { %v33_v6 = vsub.f32 %v21_v0, %v31_v5 }
  0x94   :  { %v29_v7 = vpop.xlane.xlu0 %28 }
  0x95   :  { %v32_v8 = vmul.f32 0.03125, %v29_v7  ;;  %v35_v9 = vmul.f32 %v33_v6, %v33_v6 }
  0x97   :  { %v34_v10 = vsub.f32 %v22_v1, %v32_v8  ;;  %v37_v11 = vsel %vm23_vm0, %v35_v9, 0.0 }
  0x98   :  { %38 = vadd.xlane.f32.xlu1 %v37_v11 }
  0x99   :  { %v36_v12 = vmul.f32 %v34_v10, %v34_v10 }
  0x9b   :  { %v40_v13 = vsel %vm23_vm0, %v36_v12, 0.0 }
  0x9c   :  { %41 = vadd.xlane.f32.xlu1 %v40_v13 }
 0x125   :  { %v39_v17 = vpop.xlane.xlu1 %38 }
 0x126   :  { %v43_v18 = vmul.f32 0.03125, %v39_v17 }
 0x128   :  { %v45_v19 = vadd.f32 1e-05, %v43_v18 }
 0x129   :  { %v42_v20 = vpop.xlane.xlu1 %41 }
 0x12a   :  { %183 = vrsqrt.f32 %v45_v19  ;;  %v44_v21 = vmul.f32 0.03125, %v42_v20 }
 0x12c   :  { %v46_v22 = vadd.f32 1e-05, %v44_v21 }
 0x12e   :  { %185 = vrsqrt.f32 %v46_v22 }
 0x134   :  { %v184_v23 = vpop.eup %183 }
 0x135   :  { %v49_v24 = vmul.f32 %v184_v23, %v33_v6 }
 0x137   :  { %v58_v28 = vmul.f32 %v162_v25, %v49_v24 }
 0x138   :  { %v186_v26 = vpop.eup %185 }
 0x139   :  { %v50_v27 = vmul.f32 %v186_v26, %v34_v10  ;;  %v67_v31 = vadd.f32 %v163_v29, %v58_v28 }
 0x13b   :  { %v59_v30 = vmul.f32 %v162_v25, %v50_v27 }
 0x13d   :  { %v68_v32 = vadd.f32 %v163_v29, %v59_v30 }
 0x13f   :  { %v69_v33 = vpack.c.bf16 %v68_v32, %v67_v31 }
 0x141   :  { %176 = vmatmul.mubr.msk.bf16.vlgmr.msra.gmra.mrb[0].mxu0 %vm23_vm0, %v69_v33 }
 0x214   :  { %v130_v35 = vpop.f32.mrb[0].mxu0 }
 0x215   :  { %v131_v36 = vadd.f32 %v164_v34, %v130_v35  ;;  %v177_v37 = vpop.f32.mrb[1].mxu0 }
 0x216   :  { %v133_v38 = vpop.f32.mrb[2].mxu0 }
 0x217   :  { %v139_v39 = vmul.f32 0.044715, %v131_v36  ;;  %v134_v40 = vadd.f32 %v164_v34, %v133_v38  ;;  %v178_v41 = vpop.f32.mrb[3].mxu0  ;;  %v137_v52 = vmul.f32 0.5, %v131_v36 }
 0x219   :  { %v141_v42 = vmul.f32 %v139_v39, %v131_v36  ;;  %v140_v43 = vmul.f32 0.044715, %v134_v40  ;;  %v138_v56 = vmul.f32 0.5, %v134_v40 }
 0x21b   :  { %v143_v44 = vmul.f32 %v141_v42, %v131_v36  ;;  %v142_v45 = vmul.f32 %v140_v43, %v134_v40 }
 0x21d   :  { %v145_v46 = vadd.f32 %v143_v44, %v131_v36  ;;  %v144_v47 = vmul.f32 %v142_v45, %v134_v40 }
 0x21f   :  { %v147_v48 = vmul.f32 0.7978846, %v145_v46  ;;  %v146_v49 = vadd.f32 %v144_v47, %v134_v40 }
 0x221   :  { %187 = vtanh.f32 %v147_v48  ;;  %v148_v50 = vmul.f32 0.7978846, %v146_v49 }
 0x223   :  { %189 = vtanh.f32 %v148_v50 }
 0x22b   :  { %v188_v51 = vpop.eup %187 }
 0x22c   :  { %v151_v53 = vadd.f32 1.0, %v188_v51 }
 0x22d   :  { %v190_v54 = vpop.eup %189 }
 0x22e   :  { %v153_v55 = vmul.f32 %v151_v53, %v137_v52  ;;  %v152_v57 = vadd.f32 1.0, %v190_v54 }
 0x230   :  { %156 = vst.msk [vmem:[%s260_s5] sm:$0xff] %vm155_vm2, %v153_v55  ;;  %v154_v58 = vmul.f32 %v152_v57, %v138_v56 }
 0x232   :  { %157 = vst.msk [vmem:[%s260_s5 + $0x8] sm:$0xff] %vm155_vm2, %v154_v58 }

// kernel: squeeze.1
= control target key start
LH: loop header
LB: loop body
LE: loop exit
PB: predicated region body
PF: predicated region fallthrough
CT: control target
= control target key end

     0   :  { %s85_s0 = inlined_call_operand.vmem [shape: s32[16], index: 0, kind: input, shape index: {}]   ;;  %s86_s1 = inlined_call_operand.hbm [shape: s32[2,8], index: 1, kind: output, shape index: {}]  }
   0x1   :  { %v5_v0 = vld [vmem:[%s85_s0] sm:$0x1] }
   0x2   :  { %2 = vsyncpa [#allocation1], 0  ;;  %6 = vst [vmem:[#allocation3] sm:$0x1] %v5_v0  ;;  %vm8_vm0 = vcmask 64512   ;;  %s58_s0 = smov 120  }
   0x3   :  { %s59_s8 = smov [#allocation0]  }
   0x4   :  { %s26_s9 = sshll.u32 %s59_s8, 4  ;;  %s27_s9 = int_to_ptr.vmem [resolvable:$true] %s26_s9 }
   0x5   :  { %s34_s10 = scalar_lea.vmem %s27_s9, 32  ;;  %p39_p1 = scmp.lt.s32.totalorder %s27_s9, %s27_s9 }
   0x6   :  { %p35_p0 = scmp.ne.s32.totalorder %s27_s9, %s34_s10  ;;  %p40_p2 = scmp.lt.s32.totalorder %s34_s10, %s34_s10 }
   0x8   :  { %p41_p3 = por %p40_p2, %p39_p1 }
   0x9   :  { %v10_v1 = vld [vmem:[#allocation3] sm:$0x1]  }
   0xa   :  { %v7_v2 = vld [vmem:[#allocation3] sm:$0x1]   ;;  %11 = vrot.lane.b32.xlu0 %v10_v1, %s58_s0  ;;  %p42_p4 = pnand %p41_p3, %p35_p0 }
   0xb   :  { %9 = vst.msk [vmem:[#allocation2] sm:$0x1] %vm8_vm0, %v7_v2  }
  0x7c   :  { %v12_v3 = vpop.permute.xlu0 %11  }
  0x7d   :  { %15 = vst.msk [vmem:[#allocation2 + $0x1] sm:$0x1] %vm8_vm0, %v12_v3  }
  0x84   :  { %v19_v4 = vld [vmem:[#allocation2] sm:$0x3] }
  0x85   :  { %21 = vst [vmem:[#allocation0] sm:$0x3] %v19_v4 }
  0x86   :  { %45 = shalt.err (!%p42_p4)
}
  0x87   :  { %s46_s13 = scalar_lea.hbm %s86_s1, 32 }
  0x88   :  { %p47_p5 = scmp.ne.s32.totalorder %s86_s1, %s46_s13  ;;  %p50_p6 = scmp.lt.u32.totalorder %s46_s13, %s86_s1 }
  0x8a   :  { %p52_p7 = pnand %p50_p6, %p47_p5 }
  0x8c   :  { %55 = shalt.err (!%p52_p7)
}
  0x8d   :  { %29 = dma.vmem_to_hbm [thread:$0]  %s27_s9, 32, %s86_s1, [#allocation1]  }
  0x8e   :  { %56 = dma.done.wait [#allocation1], 32  }
  0x8f   :  { %57 = vsyncadd [#allocation1], 4294967264 }
  0x90   :  { %31 = vsyncpa [#allocation1], 1 }

// kernel: gpt2_forward.16
= control target key start
LH: loop header
LB: loop body
LE: loop exit
PB: predicated region body
PF: predicated region fallthrough
CT: control target
= control target key end

     0   :  { %v147_v0 = vmov 0.0   ;;  %vm148_vm0 = vmmov 0   ;;  %vm64_vm1 = vcmask 523264   ;;  %vm111_vm2 = vcmask 261120   ;;  %s207_s1 = inlined_call_operand.vmem [shape: bf16[64,32], index: 1, kind: input, shape index: {}]   ;;  %s208_s0 = inlined_call_operand.vmem [shape: f32[16,64], index: 0, kind: input, shape index: {}]   ;;  %s209_s2 = inlined_call_operand.vmem [shape: f32[1,32], index: 2, kind: input, shape index: {}]   ;;  %s210_s3 = inlined_call_operand.vmem [shape: f32[16,32], index: 3, kind: input, shape index: {}]   ;;  %s211_s4 = inlined_call_operand.vmem [shape: f32[16,32], index: 4, kind: output, shape index: {}]  }
   0x1   :  { %129 = vmatprep.subr.bf16.mxu0 %v147_v0  ;;  %v143_v1 = vld [vmem:[%s207_s1] sm:$0xff]   ;;  %137 = vmatprep.mubr.msk.bf16.mxu0 %vm148_vm0, %v147_v0  ;;  %v144_v2 = vld [vmem:[%s207_s1 + $0x8] sm:$0xff]   ;;  %v145_v3 = vld [vmem:[%s207_s1 + $0x10] sm:$0xff]  }
   0x2   :  { %130 = vmatpush3.bf16.msra.mxu0 %v143_v1  ;;  %v146_v4 = vld [vmem:[%s207_s1 + $0x18] sm:$0xff]   ;;  %v29_v5 = vld [vmem:[%s208_s0] sm:$0xff]  ;;  %v30_v6 = vld [vmem:[%s208_s0 + $0x8] sm:$0xff] }
   0x3   :  { %131 = vmatprep.subr.bf16.mxu0 %v147_v0  ;;  %v31_v7 = vpack.c.bf16 %v30_v6, %v29_v5  ;;  %v18_v8 = vld [vmem:[%s210_s3] sm:$0xff]  ;;  %v19_v10 = vld [vmem:[%s210_s3 + $0x8] sm:$0xff] }
   0x4   :  { %v118_v9 = vld [vmem:[%s209_s2] ss:$0 sm:$0xff] }
   0x5   :  { %v27_v11 = vadd.f32 %v118_v9, %v18_v8  ;;  %v28_v12 = vadd.f32 %v118_v9, %v19_v10 }
   0x6   :  { %132 = vmatpush3.bf16.msra.mxu0 %v144_v2 }
   0x7   :  { %133 = vmatprep.subr.bf16.mxu0 %v147_v0 }
   0xa   :  { %134 = vmatpush3.bf16.msra.mxu0 %v145_v3 }
   0xb   :  { %135 = vmatprep.subr.bf16.mxu0 %v147_v0 }
   0xe   :  { %136 = vmatpush3.bf16.msra.mxu0 %v146_v4 }
  0x11   :  { %138 = vmatmul.mubr.msk.bf16.vlgmr.msra.gmra.mrb[0].mxu0 %vm64_vm1, %v31_v7 }
  0xe4   :  { %v102_v13 = vpop.f32.mrb[0].mxu0 }
  0xe5   :  { %v109_v14 = vadd.f32 %v102_v13, %v27_v11  ;;  %v139_v15 = vpop.f32.mrb[1].mxu0 }
  0xe6   :  { %v105_v16 = vpop.f32.mrb[2].mxu0 }
  0xe7   :  { %112 = vst.msk [vmem:[%s211_s4] sm:$0xff] %vm111_vm2, %v109_v14  ;;  %v110_v17 = vadd.f32 %v105_v16, %v28_v12  ;;  %v140_v18 = vpop.f32.mrb[3].mxu0 }
  0xe9   :  { %113 = vst.msk [vmem:[%s211_s4 + $0x8] sm:$0xff] %vm111_vm2, %v110_v17 }

// kernel: gpt2_forward.22
= control target key start
LH: loop header
LB: loop body
LE: loop exit
PB: predicated region body
PF: predicated region fallthrough
CT: control target
= control target key end

     0   :  { %vm20_vm0 = vcmask 261120   ;;  %v251_v4 = vmov 0.0   ;;  %vm252_vm1 = vmmov 0   ;;  %s333_s0 = inlined_call_operand.vmem [shape: f32[16,32], index: 0, kind: input, shape index: {}]   ;;  %s334_s3 = inlined_call_operand.vmem [shape: bf16[128,32], index: 3, kind: input, shape index: {}]   ;;  %s335_s1 = inlined_call_operand.vmem [shape: f32[1,32], index: 1, kind: input, shape index: {}]   ;;  %s336_s2 = inlined_call_operand.vmem [shape: f32[1,32], index: 2, kind: input, shape index: {}]   ;;  %s337_s4 = inlined_call_operand.vmem [shape: f32[16,128], index: 4, kind: output, shape index: {}]  }
   0x1   :  { %v18_v0 = vld [vmem:[%s333_s0] sm:$0xff]  ;;  %v19_v1 = vld [vmem:[%s333_s0 + $0x8] sm:$0xff]  ;;  %217 = vmatprep.subr.bf16.mxu0 %v251_v4  ;;  %v241_v9 = vld [vmem:[%s334_s3 + $0x10] sm:$0xff]   ;;  %233 = vmatprep.mubr.msk.bf16.mxu0 %vm252_vm1, %v251_v4 }
   0x2   :  { %v21_v2 = vsel %vm20_vm0, %v18_v0, 0.0  ;;  %v24_v3 = vsel %vm20_vm0, %v19_v1, 0.0  ;;  %v239_v5 = vld [vmem:[%s334_s3] sm:$0xff]   ;;  %v240_v7 = vld [vmem:[%s334_s3 + $0x8] sm:$0xff]   ;;  %v133_v10 = vsel %vm20_vm0, %v241_v9, 0  ;;  %v242_v11 = vld [vmem:[%s334_s3 + $0x18] sm:$0xff]  }
   0x3   :  { %22 = vadd.xlane.f32.xlu0 %v21_v2  ;;  %v127_v6 = vsel %vm20_vm0, %v239_v5, 0  ;;  %v130_v8 = vsel %vm20_vm0, %v240_v7, 0  ;;  %v136_v12 = vsel %vm20_vm0, %v242_v11, 0  ;;  %v243_v13 = vld [vmem:[%s334_s3 + $0x20] sm:$0xff]   ;;  %v244_v25 = vld [vmem:[%s334_s3 + $0x28] sm:$0xff]   ;;  %v245_v27 = vld [vmem:[%s334_s3 + $0x30] sm:$0xff]  }
   0x4   :  { %218 = vmatpush3.bf16.xpose.msra.mxu0 %v127_v6  ;;  %v139_v14 = vsel %vm20_vm0, %v243_v13, 0  ;;  %v142_v26 = vsel %vm20_vm0, %v244_v25, 0  ;;  %v145_v28 = vsel %vm20_vm0, %v245_v27, 0  ;;  %v246_v29 = vld [vmem:[%s334_s3 + $0x38] sm:$0xff]   ;;  %v197_v39 = vld [vmem:[%s335_s1] ss:$0 sm:$0xff] }
   0x5   :  { %219 = vmatprep.subr.bf16.mxu0 %v251_v4  ;;  %v148_v30 = vsel %vm20_vm0, %v246_v29, 0  ;;  %v198_v43 = vld [vmem:[%s336_s2] ss:$0 sm:$0xff] }
   0x7   :  { %25 = vadd.xlane.f32.xlu0 %v24_v3 }
   0xc   :  { %220 = vmatpush3.bf16.xpose.msra.mxu0 %v130_v8 }
   0xd   :  { %221 = vmatprep.subr.bf16.mxu0 %v251_v4 }
  0x14   :  { %222 = vmatpush3.bf16.xpose.msra.mxu0 %v133_v10 }
  0x15   :  { %223 = vmatprep.subr.bf16.mxu0 %v251_v4 }
  0x1c   :  { %224 = vmatpush3.bf16.xpose.msra.mxu0 %v136_v12 }
  0x1d   :  { %225 = vmatprep.subr.bf16.mxu0 %v251_v4 }
  0x24   :  { %226 = vmatpush3.bf16.xpose.msra.mxu0 %v139_v14 }
  0x25   :  { %227 = vmatprep.subr.bf16.mxu0 %v251_v4 }
  0x2c   :  { %228 = vmatpush3.bf16.xpose.msra.mxu0 %v142_v26 }
  0x2d   :  { %229 = vmatprep.subr.bf16.mxu0 %v251_v4 }
  0x34   :  { %230 = vmatpush3.bf16.xpose.msra.mxu0 %v145_v28 }
  0x35   :  { %231 = vmatprep.subr.bf16.mxu0 %v251_v4 }
  0x3c   :  { %232 = vmatpush3.bf16.xpose.msra.mxu0 %v148_v30 }
  0x90   :  { %v23_v15 = vpop.xlane.xlu0 %22 }
  0x91   :  { %v28_v16 = vmul.f32 0.03125, %v23_v15 }
  0x93   :  { %v30_v17 = vsub.f32 %v18_v0, %v28_v16 }
  0x94   :  { %v26_v18 = vpop.xlane.xlu0 %25 }
  0x95   :  { %v29_v19 = vmul.f32 0.03125, %v26_v18  ;;  %v32_v20 = vmul.f32 %v30_v17, %v30_v17 }
  0x97   :  { %v31_v21 = vsub.f32 %v19_v1, %v29_v19  ;;  %v34_v22 = vsel %vm20_vm0, %v32_v20, 0.0 }
  0x98   :  { %35 = vadd.xlane.f32.xlu1 %v34_v22 }
  0x99   :  { %v33_v23 = vmul.f32 %v31_v21, %v31_v21 }
  0x9b   :  { %v37_v24 = vsel %vm20_vm0, %v33_v23, 0.0 }
  0x9c   :  { %38 = vadd.xlane.f32.xlu1 %v37_v24 }
 0x125   :  { %v36_v31 = vpop.xlane.xlu1 %35 }
 0x126   :  { %v40_v32 = vmul.f32 0.03125, %v36_v31 }
 0x128   :  { %v42_v33 = vadd.f32 1e-05, %v40_v32 }
 0x129   :  { %v39_v34 = vpop.xlane.xlu1 %38 }
 0x12a   :  { %247 = vrsqrt.f32 %v42_v33  ;;  %v41_v35 = vmul.f32 0.03125, %v39_v34 }
 0x12c   :  { %v43_v36 = vadd.f32 1e-05, %v41_v35 }
 0x12e   :  { %249 = vrsqrt.f32 %v43_v36 }
 0x134   :  { %v248_v37 = vpop.eup %247 }
 0x135   :  { %v46_v38 = vmul.f32 %v248_v37, %v30_v17 }
 0x137   :  { %v55_v42 = vmul.f32 %v197_v39, %v46_v38 }
 0x138   :  { %v250_v40 = vpop.eup %249 }
 0x139   :  { %v47_v41 = vmul.f32 %v250_v40, %v31_v21  ;;  %v64_v45 = vadd.f32 %v198_v43, %v55_v42 }
 0x13b   :  { %v56_v44 = vmul.f32 %v197_v39, %v47_v41 }
 0x13d   :  { %v65_v46 = vadd.f32 %v198_v43, %v56_v44 }
 0x13f   :  { %v66_v47 = vpack.c.bf16 %v65_v46, %v64_v45 }
 0x141   :  { %234 = vmatmul.mubr.msk.bf16.vlgmr.msra.gmra.mrb[0].mxu0 %vm20_vm0, %v66_v47 }
 0x214   :  { %v184_v48 = vpop.f32.mrb[0].mxu0 }
 0x215   :  { %191 = vst [vmem:[%s337_s4] sm:$0xff] %v184_v48  ;;  %v235_v49 = vpop.f32.mrb[1].mxu0 }
 0x216   :  { %v187_v50 = vpop.f32.mrb[2].mxu0 }
 0x217   :  { %192 = vst [vmem:[%s337_s4 + $0x8] sm:$0xff] %v187_v50  ;;  %v236_v51 = vpop.f32.mrb[3].mxu0 }

// kernel: gpt2_forward.23
= control target key start
LH: loop header
LB: loop body
LE: loop exit
PB: predicated region body
PF: predicated region fallthrough
CT: control target
= control target key end

     0   :  { %s167_s0 = inlined_call_operand.vmem [shape: f32[16,128], index: 0, kind: input, shape index: {}]   ;;  %s168_s1 = inlined_call_operand.hbm [shape: f32[16,128], index: 1, kind: output, shape index: {0}]   ;;  %s169_s2 = inlined_call_operand.vmem [shape: s32[16,1], index: 2, kind: output, shape index: {1}]  }
   0x1   :  { %v11_v0 = vld [vmem:[%s167_s0] sm:$0xff] }
   0x2   :  { %8 = vsyncpa [#allocation3], 0  ;;  %13 = vmax.xlane.f32.xlu0 %v11_v0  ;;  %v12_v1 = vld [vmem:[%s167_s0 + $0x8] sm:$0xff]  ;;  %v33_v2 = vlaneseq  ;;  %s125_s0 = smov [#allocation2]  }
   0x3   :  { %s75_s13 = sshll.u32 %s125_s0, 4  ;;  %s76_s13 = int_to_ptr.vmem [resolvable:$true] %s75_s13 }
   0x4   :  { %v34_v3 = vand.u32 127, %v33_v2  ;;  %s101_s14 = scalar_lea.vmem %s76_s13, 256  ;;  %p106_p1 = scmp.lt.s32.totalorder %s76_s13, %s76_s13 }
   0x5   :  { %p102_p0 = scmp.ne.s32.totalorder %s76_s13, %s101_s14  ;;  %p107_p2 = scmp.lt.s32.totalorder %s101_s14, %s101_s14 }
   0x6   :  { %15 = vmax.xlane.f32.xlu0 %v12_v1 }
   0x7   :  { %p108_p3 = por %p107_p2, %p106_p1 }
   0x9   :  { %p109_p4 = pnand %p108_p3, %p102_p0 }
  0x8f   :  { %v14_v4 = vpop.xlane.xlu0 %13 }
  0x90   :  { %v17_v5 = vsub.f32 %v11_v0, %v14_v4  ;;  %vm35_vm0 = vcmp.eq.f32.partialorder %v11_v0, %v14_v4 }
  0x91   :  { %v37_v6 = vsel %vm35_vm0, %v34_v3, 128 }
  0x92   :  { %v19_v7 = vmul.f32 1.442695, %v17_v5  ;;  %v40_v8 = vshra.s32 %v37_v6, 16  ;;  %v39_v18 = vand.u32 65535, %v37_v6 }
  0x93   :  { %v16_v9 = vpop.xlane.xlu0 %15 }
  0x94   :  { %93 = vpow2.f32 %v19_v7  ;;  %v18_v10 = vsub.f32 %v12_v1, %v16_v9  ;;  %vm36_vm1 = vcmp.eq.f32.partialorder %v12_v1, %v16_v9  ;;  %v42_v11 = vcvt.s32.f32 %v40_v8 }
  0x95   :  { %v38_v12 = vsel %vm36_vm1, %v34_v3, 128  ;;  %v41_v20 = vcvt.s32.f32 %v39_v18 }
  0x96   :  { %v21_v13 = vmul.f32 1.442695, %v18_v10  ;;  %43 = vmin.xlane.f32.xlu1 %v42_v11  ;;  %v54_v14 = vshra.s32 %v38_v12, 16  ;;  %v53_v21 = vand.u32 65535, %v38_v12 }
  0x98   :  { %95 = vpow2.f32 %v21_v13  ;;  %v56_v15 = vcvt.s32.f32 %v54_v14  ;;  %v55_v24 = vcvt.s32.f32 %v53_v21 }
  0x9a   :  { %57 = vmin.xlane.f32.xlu1 %v56_v15 }
  0x9e   :  { %v94_v16 = vpop.eup %93 }
  0x9f   :  { %23 = vadd.xlane.f32.xlu0 %v94_v16 }
  0xa2   :  { %v96_v17 = vpop.eup %95 }
  0xa3   :  { %25 = vadd.xlane.f32.xlu1 %v96_v17 }
 0x123   :  { %v44_v19 = vpop.xlane.xlu1 %43 }
 0x124   :  { %vm45_vm2 = vcmp.eq.f32.partialorder %v42_v11, %v44_v19 }
 0x125   :  { %v46_v22 = vsel %vm45_vm2, %v41_v20, inf }
 0x126   :  { %47 = vmin.xlane.f32.xlu0 %v46_v22 }
 0x127   :  { %v58_v23 = vpop.xlane.xlu1 %57 }
 0x128   :  { %vm59_vm3 = vcmp.eq.f32.partialorder %v56_v15, %v58_v23 }
 0x129   :  { %v60_v25 = vsel %vm59_vm3, %v55_v24, inf }
 0x12a   :  { %61 = vmin.xlane.f32.xlu1 %v60_v25 }
 0x12c   :  { %v24_v26 = vpop.xlane.xlu0 %23 }
 0x12d   :  { %97 = vrcp.f32 %v24_v26 }
 0x130   :  { %v26_v27 = vpop.xlane.xlu1 %25 }
 0x131   :  { %99 = vrcp.f32 %v26_v27 }
 0x137   :  { %v98_v28 = vpop.eup %97 }
 0x138   :  { %v28_v29 = vmul.f32 %v98_v28, %v94_v16 }
 0x13a   :  { %31 = vst [vmem:[#allocation2] sm:$0xff] %v28_v29 }
 0x13b   :  { %v100_v30 = vpop.eup %99 }
 0x13c   :  { %v30_v31 = vmul.f32 %v100_v30, %v96_v17 }
 0x13e   :  { %32 = vst [vmem:[#allocation2 + $0x8] sm:$0xff] %v30_v31 }
 0x13f   :  { %112 = shalt.err (!%p109_p4)
}
 0x140   :  { %s113_s17 = scalar_lea.hbm %s168_s1, 256 }
 0x141   :  { %p114_p5 = scmp.ne.s32.totalorder %s168_s1, %s113_s17  ;;  %p117_p6 = scmp.lt.u32.totalorder %s113_s17, %s168_s1 }
 0x143   :  { %p119_p7 = pnand %p117_p6, %p114_p5 }
 0x145   :  { %122 = shalt.err (!%p119_p7)
}
 0x146   :  { %s126_s22 = smov 128   ;;  %s127_s23 = smov 8   ;;  %v50_v32 = vcvt.f32.s32 %v44_v19  ;;  %v64_v35 = vcvt.f32.s32 %v58_v23  ;;  %vm67_vm4 = vcmask 7168  }
 0x147   :  { %81 = dma.vmem_to_hbm [thread:$0]  %s76_s13, 256, %s168_s1, [#allocation3], %s126_s22, %s126_s22, %s127_s23  }
 0x148   :  { %v51_v34 = vshll.u32 %v50_v32, 16  ;;  %v65_v39 = vshll.u32 %v64_v35, 16 }
 0x1b3   :  { %v48_v33 = vpop.xlane.xlu0 %47 }
 0x1b4   :  { %v49_v36 = vcvt.f32.s32 %v48_v33 }
 0x1b6   :  { %v52_v37 = vadd.s32 %v51_v34, %v49_v36 }
 0x1b7   :  { %v62_v38 = vpop.xlane.xlu1 %61 }
 0x1b8   :  { %68 = vst.msk [vmem:[%s169_s2] sm:$0xff] %vm67_vm4, %v52_v37  ;;  %v63_v40 = vcvt.f32.s32 %v62_v38 }
 0x1ba   :  { %v66_v41 = vadd.s32 %v65_v39, %v63_v40 }
 0x1bc   :  { %69 = vst.msk [vmem:[%s169_s2 + $0x8] sm:$0xff] %vm67_vm4, %v66_v41 }
 0x1bd   :  { %123 = dma.done.wait [#allocation3], 256  }
 0x1be   :  { %124 = vsyncadd [#allocation3], 4294967040 }
 0x1bf   :  { %89 = vsyncpa [#allocation3], 1 }

</bundles_post_ra>
